<compile_context>
chip_gen: v6e
topology: v6e:2x2x1
jax: 0.10.0
libtpu: 0.0.40
codegen_flags: <defaults>
</compile_context>

<pallas_src>
import functools

import jax
import jax.numpy as jnp
from jax.experimental import pallas as pl
from jax.experimental.pallas import tpu as pltpu


def _lstm_block_kernel(x_ref, wih_ref, whh_ref, b_ref, out_ref, h_scr, c_scr,
                       *, steps, batch, hidden, emit_seq):
    """Processes `steps` timesteps of one LSTM layer per grid iteration.

    x_ref   : (steps*batch, Din)  time-major flattened input block (pipelined)
    wih_ref : (Din, 4H) bf16      fused input weights [i|f|g|o]  (VMEM-resident)
    whh_ref : (H, 4H)   bf16      fused recurrent weights        (VMEM-resident)
    b_ref   : (1, 4H)   f32       fused bias b_ih + b_hh         (VMEM-resident)
    out_ref : (steps*batch, H) bf16 if emit_seq else (batch, H) f32
    h_scr / c_scr : (batch, H) f32 recurrent state, persists across grid steps
    """
    t = pl.program_id(0)
    H = hidden

    @pl.when(t == 0)
    def _():
        h_scr[...] = jnp.zeros(h_scr.shape, h_scr.dtype)
        c_scr[...] = jnp.zeros(c_scr.shape, c_scr.dtype)

    # Hoisted, gate-fused input projection: ONE (steps*batch, Din) @ (Din, 4H)
    # bf16 matmul with f32 accumulation + ONE bias broadcast per time block.
    x_blk = x_ref[...].astype(jnp.bfloat16)                       # (steps*batch, Din)
    xg = jnp.dot(x_blk, wih_ref[...],
                 preferred_element_type=jnp.float32) + b_ref[...]  # (steps*batch, 4H) f32

    whh = whh_ref[...]                                             # (H, 4H) bf16, hoisted

    h = h_scr[...]
    c = c_scr[...]
    hs = []

    # Unrolled inner time loop (steps <= 16).  Only h @ W_hh is serial, and it
    # is a single fused N=4H MXU issue per step.  `batch` is a multiple of 8
    # (padded in the wrapper), so the xg row slices are sublane-tile aligned.
    for s in range(steps):
        r0 = s * batch
        z = xg[r0:r0 + batch] + jnp.dot(h.astype(jnp.bfloat16), whh,
                                        preferred_element_type=jnp.float32)  # (batch, 4H)
        i_g = jax.nn.sigmoid(z[:, 0 * H:1 * H])
        f_g = jax.nn.sigmoid(z[:, 1 * H:2 * H])
        g_g = jnp.tanh(z[:, 2 * H:3 * H])
        o_g = jax.nn.sigmoid(z[:, 3 * H:4 * H])
        c = f_g * c + i_g * g_g
        h = o_g * jnp.tanh(c)
        if emit_seq:
            hs.append(h)

    h_scr[...] = h
    c_scr[...] = c

    if emit_seq:
        # One dense, tile-aligned block store instead of per-step partial vst.
        out_ref[...] = jnp.concatenate(hs, axis=0).astype(out_ref.dtype)
    else:
        # Last layer: only the final hidden state is consumed; write it once.
        @pl.when(t == pl.num_programs(0) - 1)
        def _():
            out_ref[...] = h.astype(out_ref.dtype)


def _pick_time_block(seq_len, max_steps=16):
    """Largest divisor of seq_len that is <= max_steps (always >= 1)."""
    for tb in range(min(max_steps, seq_len), 0, -1):
        if seq_len % tb == 0:
            return tb
    return 1


def _vmem_cap_bytes():
    """Generation-aware VMEM budget: ~100 MiB on 128 MiB parts (v5e/v6e),
    ~48 MiB on 64 MiB v7x, conservative fallback if the query fails."""
    cap = 64 << 20
    try:
        cap = int(getattr(pltpu.get_tpu_info(), "vmem_capacity_bytes", cap))
    except Exception:
        pass
    return int(min(cap * 3 // 4, 100 << 20))


def _lstm_layer(x2d, w_ih, w_hh, bias, *, seq_len, batch, last):
    """One LSTM layer over a time-major flattened sequence.

    x2d: (seq_len*batch, Din) with batch % 8 == 0.  Returns the full
    (seq_len*batch, H) bf16 hidden sequence, or only the final (batch, H) f32
    state when `last`.
    """
    d_in = x2d.shape[1]
    hidden = w_hh.shape[0]
    tb = _pick_time_block(seq_len)
    grid = (seq_len // tb,)
    blk_rows = tb * batch

    if last:
        out_shape = jax.ShapeDtypeStruct((batch, hidden), jnp.float32)
        out_spec = pl.BlockSpec((batch, hidden), lambda t: (0, 0))
        out_blk_bytes = batch * hidden * 4                       # resident, single copy
    else:
        out_shape = jax.ShapeDtypeStruct((seq_len * batch, hidden), jnp.bfloat16)
        out_spec = pl.BlockSpec((blk_rows, hidden), lambda t: (t, 0))
        out_blk_bytes = 2 * blk_rows * hidden * 2                # double-buffered bf16

    # Precise VMEM footprint: resident weights + double-buffered input block +
    # output block(s) + hoisted projection intermediate + collected hidden
    # block + recurrent state + per-step gate temporaries, plus 25% headroom.
    nbytes = lambda a: a.size * a.dtype.itemsize
    est = (nbytes(w_ih) + nbytes(w_hh) + nbytes(bias)
           + 2 * blk_rows * d_in * x2d.dtype.itemsize
           + out_blk_bytes
           + blk_rows * 4 * hidden * 4          # xg (f32)
           + blk_rows * hidden * 4              # concatenated hs before the store
           + 2 * batch * hidden * 4             # h / c scratch
           + 4 * batch * 4 * hidden * 4)        # per-step gate temporaries
    vmem_limit = int(max(16 << 20, min(_vmem_cap_bytes(), int(est * 1.25) + (2 << 20))))

    kernel = functools.partial(_lstm_block_kernel, steps=tb, batch=batch,
                               hidden=hidden, emit_seq=not last)

    return pl.pallas_call(
        kernel,
        out_shape=out_shape,
        grid_spec=pltpu.PrefetchScalarGridSpec(
            num_scalar_prefetch=0,
            grid=grid,
            in_specs=[
                # time-blocked input, pipelined HBM -> VMEM
                pl.BlockSpec((blk_rows, d_in), lambda t: (t, 0)),
                # weights/bias: whole-array VMEM residents, loaded once.
                pl.BlockSpec(memory_space=pltpu.MemorySpace.VMEM),   # W_ih (Din,4H) bf16
                pl.BlockSpec(memory_space=pltpu.MemorySpace.VMEM),   # W_hh (H,4H)   bf16
                pl.BlockSpec(memory_space=pltpu.MemorySpace.VMEM),   # bias (1,4H)   f32
            ],
            out_specs=out_spec,
            scratch_shapes=[
                pltpu.VMEM((batch, hidden), jnp.float32),   # h state
                pltpu.VMEM((batch, hidden), jnp.float32),   # c state
            ],
        ),
        # The time axis carries the recurrence through h/c scratch, so it MUST
        # stay "arbitrary" (sequential).  Never mark it "parallel".
        compiler_params=pltpu.CompilerParams(
            dimension_semantics=("arbitrary",),
            vmem_limit_bytes=vmem_limit,
        ),
    )(x2d, w_ih, w_hh, bias)


def init_rnn_params(key, in_dim, hidden_dim, n_layer):
    """PyTorch-style uniform(-1/sqrt(H), 1/sqrt(H)) init.

    Returns (kernel_params, ref_params):
      kernel_params[l]: gate-fused transposed weights (order [i|f|g|o]) in bf16
                        plus a fused f32 bias.
      ref_params[l]:    same layout in f32 for the pure-JAX reference.
    """
    H = hidden_dim
    bound = float(hidden_dim) ** -0.5
    kernel_params, ref_params = [], []
    for layer in range(n_layer):
        d_in = in_dim if layer == 0 else hidden_dim
        key, k1, k2, k3, k4 = jax.random.split(key, 5)
        w_ih = jax.random.uniform(k1, (4 * H, d_in), jnp.float32, -bound, bound)
        w_hh = jax.random.uniform(k2, (4 * H, H), jnp.float32, -bound, bound)
        b_ih = jax.random.uniform(k3, (4 * H,), jnp.float32, -bound, bound)
        b_hh = jax.random.uniform(k4, (4 * H,), jnp.float32, -bound, bound)
        b = (b_ih + b_hh)[None, :]                          # (1, 4H) f32
        kernel_params.append({
            "w_ih": w_ih.T.astype(jnp.bfloat16),            # (d_in, 4H)
            "w_hh": w_hh.T.astype(jnp.bfloat16),            # (H, 4H)
            "b":    b,                                       # (1, 4H)
        })
        ref_params.append({
            "w_ih_t": w_ih.T,                                # (d_in, 4H)
            "w_hh_t": w_hh.T,                                # (H, 4H)
            "bias":   b,                                     # (1, 4H)
        })
    return kernel_params, ref_params


@jax.jit
def rnn_forward(x_btd, params):
    """x_btd: (B, T, in_dim) batch-first, like the PyTorch module.
    Returns (B, hidden_dim) = last-timestep hidden state of the last layer."""
    B, T, Din = x_btd.shape
    Bp = ((B + 7) // 8) * 8                      # pad batch to a sublane multiple
    x = jnp.transpose(x_btd, (1, 0, 2)).astype(jnp.float32)   # (T, B, Din)
    if Bp != B:
        x = jnp.pad(x, ((0, 0), (0, Bp - B), (0, 0)))
    x2d = x.reshape(T * Bp, Din)                 # time-major flatten (layout plumbing)
    n_layer = len(params)
    for li, p in enumerate(params):
        x2d = _lstm_layer(x2d, p["w_ih"], p["w_hh"], p["b"],
                          seq_len=T, batch=Bp, last=(li == n_layer - 1))
    return x2d[:B]                               # (B, hidden_dim) f32


def _reference_forward(x_btd, ref_params):
    """Pure-JAX f32 reference LSTM (for verification)."""
    x = jnp.transpose(x_btd, (1, 0, 2)).astype(jnp.float32)   # (T, B, Din)
    hi = jax.lax.Precision.HIGHEST
    for p in ref_params:
        T, B, _ = x.shape
        H = p["w_hh_t"].shape[0]

        def step(carry, x_t, p=p, H=H):
            h, c = carry
            gates = (jnp.dot(x_t, p["w_ih_t"], precision=hi)
                     + jnp.dot(h, p["w_hh_t"], precision=hi) + p["bias"])
            i = jax.nn.sigmoid(gates[:, 0 * H:1 * H])
            f = jax.nn.sigmoid(gates[:, 1 * H:2 * H])
            g = jnp.tanh(gates[:, 2 * H:3 * H])
            o = jax.nn.sigmoid(gates[:, 3 * H:4 * H])
            c = f * c + i * g
            h = o * jnp.tanh(c)
            return (h, c), h

        init = (jnp.zeros((B, H), jnp.float32), jnp.zeros((B, H), jnp.float32))
        _, hs = jax.lax.scan(step, init, x)
        x = hs
    return x[-1]


if __name__ == "__main__":
    in_dim, hidden_dim, n_layer = 4, 32, 2
    B, T = 2, 8

    key = jax.random.PRNGKey(0)
    key, kx = jax.random.split(key)
    x = jax.random.normal(kx, (B, T, in_dim), jnp.float32)

    kernel_params, ref_params = init_rnn_params(key, in_dim, hidden_dim, n_layer)

    out = rnn_forward(x, kernel_params)
    out = jax.block_until_ready(out)

    ref = _reference_forward(x, ref_params)
    assert out.shape == (B, hidden_dim)
    # Kernel runs bf16 weights / bf16 matmul LHS with f32 accumulation; the
    # reference is full f32 HIGHEST precision, so allow bf16-sized tolerance.
    assert jnp.allclose(out, ref, atol=3e-2, rtol=3e-2), "mismatch vs reference"

    print("KERNEL_OK")
</pallas_src>

<mosaic_0001>
module attributes {stable_mosaic.version = 11 : i64} {
  func.func @_lstm_block_kernel(%arg0: i32, %arg1: memref<64x4xf32, #tpu.memory_space<vmem>>, %arg2: memref<4x128xbf16, #tpu.memory_space<vmem>>, %arg3: memref<32x128xbf16, #tpu.memory_space<vmem>>, %arg4: memref<1x128xf32, #tpu.memory_space<vmem>>, %arg5: memref<64x32xbf16, #tpu.memory_space<vmem>>, %arg6: memref<8x32xf32, #tpu.memory_space<vmem>>, %arg7: memref<8x32xf32, #tpu.memory_space<vmem>>) attributes {dimension_semantics = [#tpu.dimension_semantics<arbitrary>], iteration_bounds = array<i64: 1>, scalar_prefetch = 0 : i64, scratch_operands = 2 : i64, tpu.core_type = #tpu.core_type<tc>, window_params = [{transform_indices = @transform_0, window_bounds = array<i64: 64, 4>}, {pipeline_mode = #tpu.pipeline_mode<synchronous>, transform_indices = @transform_1, window_bounds = array<i64: 4, 128>}, {pipeline_mode = #tpu.pipeline_mode<synchronous>, transform_indices = @transform_2, window_bounds = array<i64: 32, 128>}, {pipeline_mode = #tpu.pipeline_mode<synchronous>, transform_indices = @transform_3, window_bounds = array<i64: 1, 128>}, {transform_indices = @transform_4, window_bounds = array<i64: 64, 32>}]} {
    %c0_i32 = arith.constant 0 : i32
    %0 = arith.cmpi eq, %arg0, %c0_i32 : i32
    %1 = arith.extui %0 : i1 to i32
    %c0_i32_0 = arith.constant 0 : i32
    %2 = arith.cmpi ne, %1, %c0_i32_0 : i32
    scf.if %2 {
      %cst_50 = arith.constant 0.000000e+00 : f32
      %250 = vector.broadcast %cst_50 : f32 to vector<8x32xf32>
      %c0_51 = arith.constant 0 : index
      %c0_52 = arith.constant 0 : index
      %251 = vector.load %arg6[%c0_51, %c0_52] : memref<8x32xf32, #tpu.memory_space<vmem>>, vector<8x32xf32>
      tpu.vector_store %arg6[%c0_51, %c0_52], %250 {strides = array<i32>} : memref<8x32xf32, #tpu.memory_space<vmem>>, vector<8x32xf32>,
      %cst_53 = arith.constant 0.000000e+00 : f32
      %252 = vector.broadcast %cst_53 : f32 to vector<8x32xf32>
      %c0_54 = arith.constant 0 : index
      %c0_55 = arith.constant 0 : index
      %253 = vector.load %arg7[%c0_54, %c0_55] : memref<8x32xf32, #tpu.memory_space<vmem>>, vector<8x32xf32>
      tpu.vector_store %arg7[%c0_54, %c0_55], %252 {strides = array<i32>} : memref<8x32xf32, #tpu.memory_space<vmem>>, vector<8x32xf32>,
    } else {
    }
    %c0 = arith.constant 0 : index
    %c0_1 = arith.constant 0 : index
    %3 = vector.load %arg1[%c0, %c0_1] : memref<64x4xf32, #tpu.memory_space<vmem>>, vector<64x4xf32>
    %4 = arith.truncf %3 : vector<64x4xf32> to vector<64x4xbf16>
    %c0_2 = arith.constant 0 : index
    %c0_3 = arith.constant 0 : index
    %5 = vector.load %arg2[%c0_2, %c0_3] : memref<4x128xbf16, #tpu.memory_space<vmem>>, vector<4x128xbf16>
    %cst = arith.constant dense<0.000000e+00> : vector<64x128xf32>
    %6 = tpu.matmul %4, %5, %cst {dimension_numbers = #tpu.dot_dimension_numbers<[1], [0], [0], [1], [0, 0, 1, 1], [], []>} : vector<64x4xbf16>, vector<4x128xbf16>, vector<64x128xf32> -> vector<64x128xf32>
    %c0_4 = arith.constant 0 : index
    %c0_5 = arith.constant 0 : index
    %7 = vector.load %arg4[%c0_4, %c0_5] : memref<1x128xf32, #tpu.memory_space<vmem>>, vector<1x128xf32>
    %8 = vector.broadcast %7 : vector<1x128xf32> to vector<64x128xf32>
    %9 = arith.addf %6, %8 : vector<64x128xf32>
    %c0_6 = arith.constant 0 : index
    %c0_7 = arith.constant 0 : index
    %10 = vector.load %arg3[%c0_6, %c0_7] : memref<32x128xbf16, #tpu.memory_space<vmem>>, vector<32x128xbf16>
    %c0_8 = arith.constant 0 : index
    %c0_9 = arith.constant 0 : index
    %11 = vector.load %arg6[%c0_8, %c0_9] : memref<8x32xf32, #tpu.memory_space<vmem>>, vector<8x32xf32>
    %c0_10 = arith.constant 0 : index
    %c0_11 = arith.constant 0 : index
    %12 = vector.load %arg7[%c0_10, %c0_11] : memref<8x32xf32, #tpu.memory_space<vmem>>, vector<8x32xf32>
    %13 = vector.extract_strided_slice %9 {offsets = [0, 0], sizes = [8, 128], strides = [1, 1]} : vector<64x128xf32> to vector<8x128xf32>
    %14 = arith.truncf %11 : vector<8x32xf32> to vector<8x32xbf16>
    %cst_12 = arith.constant dense<0.000000e+00> : vector<8x128xf32>
    %15 = tpu.matmul %14, %10, %cst_12 {dimension_numbers = #tpu.dot_dimension_numbers<[1], [0], [0], [1], [0, 0, 1, 1], [], []>} : vector<8x32xbf16>, vector<32x128xbf16>, vector<8x128xf32> -> vector<8x128xf32>
    %16 = arith.addf %13, %15 : vector<8x128xf32>
    %17 = vector.extract_strided_slice %16 {offsets = [0, 0], sizes = [8, 32], strides = [1, 1]} : vector<8x128xf32> to vector<8x32xf32>
    %18 = arith.negf %17 : vector<8x32xf32>
    %19 = math.exp %18 : vector<8x32xf32>
    %cst_13 = arith.constant 1.000000e+00 : f32
    %20 = vector.broadcast %cst_13 : f32 to vector<8x32xf32>
    %21 = arith.addf %20, %19 : vector<8x32xf32>
    %22 = arith.divf %20, %21 : vector<8x32xf32>
    %23 = vector.extract_strided_slice %16 {offsets = [0, 32], sizes = [8, 32], strides = [1, 1]} : vector<8x128xf32> to vector<8x32xf32>
    %24 = arith.negf %23 : vector<8x32xf32>
    %25 = math.exp %24 : vector<8x32xf32>
    %cst_14 = arith.constant 1.000000e+00 : f32
    %26 = vector.broadcast %cst_14 : f32 to vector<8x32xf32>
    %27 = arith.addf %26, %25 : vector<8x32xf32>
    %28 = arith.divf %26, %27 : vector<8x32xf32>
    %29 = vector.extract_strided_slice %16 {offsets = [0, 64], sizes = [8, 32], strides = [1, 1]} : vector<8x128xf32> to vector<8x32xf32>
    %30 = math.tanh %29 : vector<8x32xf32>
    %31 = vector.extract_strided_slice %16 {offsets = [0, 96], sizes = [8, 32], strides = [1, 1]} : vector<8x128xf32> to vector<8x32xf32>
    %32 = arith.negf %31 : vector<8x32xf32>
    %33 = math.exp %32 : vector<8x32xf32>
    %cst_15 = arith.constant 1.000000e+00 : f32
    %34 = vector.broadcast %cst_15 : f32 to vector<8x32xf32>
    %35 = arith.addf %34, %33 : vector<8x32xf32>
    %36 = arith.divf %34, %35 : vector<8x32xf32>
    %37 = arith.mulf %28, %12 : vector<8x32xf32>
    %38 = arith.mulf %22, %30 : vector<8x32xf32>
    %39 = arith.addf %37, %38 : vector<8x32xf32>
    %40 = math.tanh %39 : vector<8x32xf32>
    %41 = arith.mulf %36, %40 : vector<8x32xf32>
    %42 = vector.extract_strided_slice %9 {offsets = [8, 0], sizes = [8, 128], strides = [1, 1]} : vector<64x128xf32> to vector<8x128xf32>
    %43 = arith.truncf %41 : vector<8x32xf32> to vector<8x32xbf16>
    %cst_16 = arith.constant dense<0.000000e+00> : vector<8x128xf32>
    %44 = tpu.matmul %43, %10, %cst_16 {dimension_numbers = #tpu.dot_dimension_numbers<[1], [0], [0], [1], [0, 0, 1, 1], [], []>} : vector<8x32xbf16>, vector<32x128xbf16>, vector<8x128xf32> -> vector<8x128xf32>
    %45 = arith.addf %42, %44 : vector<8x128xf32>
    %46 = vector.extract_strided_slice %45 {offsets = [0, 0], sizes = [8, 32], strides = [1, 1]} : vector<8x128xf32> to vector<8x32xf32>
    %47 = arith.negf %46 : vector<8x32xf32>
    %48 = math.exp %47 : vector<8x32xf32>
    %cst_17 = arith.constant 1.000000e+00 : f32
    %49 = vector.broadcast %cst_17 : f32 to vector<8x32xf32>
    %50 = arith.addf %49, %48 : vector<8x32xf32>
    %51 = arith.divf %49, %50 : vector<8x32xf32>
    %52 = vector.extract_strided_slice %45 {offsets = [0, 32], sizes = [8, 32], strides = [1, 1]} : vector<8x128xf32> to vector<8x32xf32>
    %53 = arith.negf %52 : vector<8x32xf32>
    %54 = math.exp %53 : vector<8x32xf32>
    %cst_18 = arith.constant 1.000000e+00 : f32
    %55 = vector.broadcast %cst_18 : f32 to vector<8x32xf32>
    %56 = arith.addf %55, %54 : vector<8x32xf32>
    %57 = arith.divf %55, %56 : vector<8x32xf32>
    %58 = vector.extract_strided_slice %45 {offsets = [0, 64], sizes = [8, 32], strides = [1, 1]} : vector<8x128xf32> to vector<8x32xf32>
    %59 = math.tanh %58 : vector<8x32xf32>
    %60 = vector.extract_strided_slice %45 {offsets = [0, 96], sizes = [8, 32], strides = [1, 1]} : vector<8x128xf32> to vector<8x32xf32>
    %61 = arith.negf %60 : vector<8x32xf32>
    %62 = math.exp %61 : vector<8x32xf32>
    %cst_19 = arith.constant 1.000000e+00 : f32
    %63 = vector.broadcast %cst_19 : f32 to vector<8x32xf32>
    %64 = arith.addf %63, %62 : vector<8x32xf32>
    %65 = arith.divf %63, %64 : vector<8x32xf32>
    %66 = arith.mulf %57, %39 : vector<8x32xf32>
    %67 = arith.mulf %51, %59 : vector<8x32xf32>
    %68 = arith.addf %66, %67 : vector<8x32xf32>
    %69 = math.tanh %68 : vector<8x32xf32>
    %70 = arith.mulf %65, %69 : vector<8x32xf32>
    %71 = vector.extract_strided_slice %9 {offsets = [16, 0], sizes = [8, 128], strides = [1, 1]} : vector<64x128xf32> to vector<8x128xf32>
    %72 = arith.truncf %70 : vector<8x32xf32> to vector<8x32xbf16>
    %cst_20 = arith.constant dense<0.000000e+00> : vector<8x128xf32>
    %73 = tpu.matmul %72, %10, %cst_20 {dimension_numbers = #tpu.dot_dimension_numbers<[1], [0], [0], [1], [0, 0, 1, 1], [], []>} : vector<8x32xbf16>, vector<32x128xbf16>, vector<8x128xf32> -> vector<8x128xf32>
    %74 = arith.addf %71, %73 : vector<8x128xf32>
    %75 = vector.extract_strided_slice %74 {offsets = [0, 0], sizes = [8, 32], strides = [1, 1]} : vector<8x128xf32> to vector<8x32xf32>
    %76 = arith.negf %75 : vector<8x32xf32>
    %77 = math.exp %76 : vector<8x32xf32>
    %cst_21 = arith.constant 1.000000e+00 : f32
    %78 = vector.broadcast %cst_21 : f32 to vector<8x32xf32>
    %79 = arith.addf %78, %77 : vector<8x32xf32>
    %80 = arith.divf %78, %79 : vector<8x32xf32>
    %81 = vector.extract_strided_slice %74 {offsets = [0, 32], sizes = [8, 32], strides = [1, 1]} : vector<8x128xf32> to vector<8x32xf32>
    %82 = arith.negf %81 : vector<8x32xf32>
    %83 = math.exp %82 : vector<8x32xf32>
    %cst_22 = arith.constant 1.000000e+00 : f32
    %84 = vector.broadcast %cst_22 : f32 to vector<8x32xf32>
    %85 = arith.addf %84, %83 : vector<8x32xf32>
    %86 = arith.divf %84, %85 : vector<8x32xf32>
    %87 = vector.extract_strided_slice %74 {offsets = [0, 64], sizes = [8, 32], strides = [1, 1]} : vector<8x128xf32> to vector<8x32xf32>
    %88 = math.tanh %87 : vector<8x32xf32>
    %89 = vector.extract_strided_slice %74 {offsets = [0, 96], sizes = [8, 32], strides = [1, 1]} : vector<8x128xf32> to vector<8x32xf32>
    %90 = arith.negf %89 : vector<8x32xf32>
    %91 = math.exp %90 : vector<8x32xf32>
    %cst_23 = arith.constant 1.000000e+00 : f32
    %92 = vector.broadcast %cst_23 : f32 to vector<8x32xf32>
    %93 = arith.addf %92, %91 : vector<8x32xf32>
    %94 = arith.divf %92, %93 : vector<8x32xf32>
    %95 = arith.mulf %86, %68 : vector<8x32xf32>
    %96 = arith.mulf %80, %88 : vector<8x32xf32>
    %97 = arith.addf %95, %96 : vector<8x32xf32>
    %98 = math.tanh %97 : vector<8x32xf32>
    %99 = arith.mulf %94, %98 : vector<8x32xf32>
    %100 = vector.extract_strided_slice %9 {offsets = [24, 0], sizes = [8, 128], strides = [1, 1]} : vector<64x128xf32> to vector<8x128xf32>
    %101 = arith.truncf %99 : vector<8x32xf32> to vector<8x32xbf16>
    %cst_24 = arith.constant dense<0.000000e+00> : vector<8x128xf32>
    %102 = tpu.matmul %101, %10, %cst_24 {dimension_numbers = #tpu.dot_dimension_numbers<[1], [0], [0], [1], [0, 0, 1, 1], [], []>} : vector<8x32xbf16>, vector<32x128xbf16>, vector<8x128xf32> -> vector<8x128xf32>
    %103 = arith.addf %100, %102 : vector<8x128xf32>
    %104 = vector.extract_strided_slice %103 {offsets = [0, 0], sizes = [8, 32], strides = [1, 1]} : vector<8x128xf32> to vector<8x32xf32>
    %105 = arith.negf %104 : vector<8x32xf32>
    %106 = math.exp %105 : vector<8x32xf32>
    %cst_25 = arith.constant 1.000000e+00 : f32
    %107 = vector.broadcast %cst_25 : f32 to vector<8x32xf32>
    %108 = arith.addf %107, %106 : vector<8x32xf32>
    %109 = arith.divf %107, %108 : vector<8x32xf32>
    %110 = vector.extract_strided_slice %103 {offsets = [0, 32], sizes = [8, 32], strides = [1, 1]} : vector<8x128xf32> to vector<8x32xf32>
    %111 = arith.negf %110 : vector<8x32xf32>
    %112 = math.exp %111 : vector<8x32xf32>
    %cst_26 = arith.constant 1.000000e+00 : f32
    %113 = vector.broadcast %cst_26 : f32 to vector<8x32xf32>
    %114 = arith.addf %113, %112 : vector<8x32xf32>
    %115 = arith.divf %113, %114 : vector<8x32xf32>
    %116 = vector.extract_strided_slice %103 {offsets = [0, 64], sizes = [8, 32], strides = [1, 1]} : vector<8x128xf32> to vector<8x32xf32>
    %117 = math.tanh %116 : vector<8x32xf32>
    %118 = vector.extract_strided_slice %103 {offsets = [0, 96], sizes = [8, 32], strides = [1, 1]} : vector<8x128xf32> to vector<8x32xf32>
    %119 = arith.negf %118 : vector<8x32xf32>
    %120 = math.exp %119 : vector<8x32xf32>
    %cst_27 = arith.constant 1.000000e+00 : f32
    %121 = vector.broadcast %cst_27 : f32 to vector<8x32xf32>
    %122 = arith.addf %121, %120 : vector<8x32xf32>
    %123 = arith.divf %121, %122 : vector<8x32xf32>
    %124 = arith.mulf %115, %97 : vector<8x32xf32>
    %125 = arith.mulf %109, %117 : vector<8x32xf32>
    %126 = arith.addf %124, %125 : vector<8x32xf32>
    %127 = math.tanh %126 : vector<8x32xf32>
    %128 = arith.mulf %123, %127 : vector<8x32xf32>
    %129 = vector.extract_strided_slice %9 {offsets = [32, 0], sizes = [8, 128], strides = [1, 1]} : vector<64x128xf32> to vector<8x128xf32>
    %130 = arith.truncf %128 : vector<8x32xf32> to vector<8x32xbf16>
    %cst_28 = arith.constant dense<0.000000e+00> : vector<8x128xf32>
    %131 = tpu.matmul %130, %10, %cst_28 {dimension_numbers = #tpu.dot_dimension_numbers<[1], [0], [0], [1], [0, 0, 1, 1], [], []>} : vector<8x32xbf16>, vector<32x128xbf16>, vector<8x128xf32> -> vector<8x128xf32>
    %132 = arith.addf %129, %131 : vector<8x128xf32>
    %133 = vector.extract_strided_slice %132 {offsets = [0, 0], sizes = [8, 32], strides = [1, 1]} : vector<8x128xf32> to vector<8x32xf32>
    %134 = arith.negf %133 : vector<8x32xf32>
    %135 = math.exp %134 : vector<8x32xf32>
    %cst_29 = arith.constant 1.000000e+00 : f32
    %136 = vector.broadcast %cst_29 : f32 to vector<8x32xf32>
    %137 = arith.addf %136, %135 : vector<8x32xf32>
    %138 = arith.divf %136, %137 : vector<8x32xf32>
    %139 = vector.extract_strided_slice %132 {offsets = [0, 32], sizes = [8, 32], strides = [1, 1]} : vector<8x128xf32> to vector<8x32xf32>
    %140 = arith.negf %139 : vector<8x32xf32>
    %141 = math.exp %140 : vector<8x32xf32>
    %cst_30 = arith.constant 1.000000e+00 : f32
    %142 = vector.broadcast %cst_30 : f32 to vector<8x32xf32>
    %143 = arith.addf %142, %141 : vector<8x32xf32>
    %144 = arith.divf %142, %143 : vector<8x32xf32>
    %145 = vector.extract_strided_slice %132 {offsets = [0, 64], sizes = [8, 32], strides = [1, 1]} : vector<8x128xf32> to vector<8x32xf32>
    %146 = math.tanh %145 : vector<8x32xf32>
    %147 = vector.extract_strided_slice %132 {offsets = [0, 96], sizes = [8, 32], strides = [1, 1]} : vector<8x128xf32> to vector<8x32xf32>
    %148 = arith.negf %147 : vector<8x32xf32>
    %149 = math.exp %148 : vector<8x32xf32>
    %cst_31 = arith.constant 1.000000e+00 : f32
    %150 = vector.broadcast %cst_31 : f32 to vector<8x32xf32>
    %151 = arith.addf %150, %149 : vector<8x32xf32>
    %152 = arith.divf %150, %151 : vector<8x32xf32>
    %153 = arith.mulf %144, %126 : vector<8x32xf32>
    %154 = arith.mulf %138, %146 : vector<8x32xf32>
    %155 = arith.addf %153, %154 : vector<8x32xf32>
    %156 = math.tanh %155 : vector<8x32xf32>
    %157 = arith.mulf %152, %156 : vector<8x32xf32>
    %158 = vector.extract_strided_slice %9 {offsets = [40, 0], sizes = [8, 128], strides = [1, 1]} : vector<64x128xf32> to vector<8x128xf32>
    %159 = arith.truncf %157 : vector<8x32xf32> to vector<8x32xbf16>
    %cst_32 = arith.constant dense<0.000000e+00> : vector<8x128xf32>
    %160 = tpu.matmul %159, %10, %cst_32 {dimension_numbers = #tpu.dot_dimension_numbers<[1], [0], [0], [1], [0, 0, 1, 1], [], []>} : vector<8x32xbf16>, vector<32x128xbf16>, vector<8x128xf32> -> vector<8x128xf32>
    %161 = arith.addf %158, %160 : vector<8x128xf32>
    %162 = vector.extract_strided_slice %161 {offsets = [0, 0], sizes = [8, 32], strides = [1, 1]} : vector<8x128xf32> to vector<8x32xf32>
    %163 = arith.negf %162 : vector<8x32xf32>
    %164 = math.exp %163 : vector<8x32xf32>
    %cst_33 = arith.constant 1.000000e+00 : f32
    %165 = vector.broadcast %cst_33 : f32 to vector<8x32xf32>
    %166 = arith.addf %165, %164 : vector<8x32xf32>
    %167 = arith.divf %165, %166 : vector<8x32xf32>
    %168 = vector.extract_strided_slice %161 {offsets = [0, 32], sizes = [8, 32], strides = [1, 1]} : vector<8x128xf32> to vector<8x32xf32>
    %169 = arith.negf %168 : vector<8x32xf32>
    %170 = math.exp %169 : vector<8x32xf32>
    %cst_34 = arith.constant 1.000000e+00 : f32
    %171 = vector.broadcast %cst_34 : f32 to vector<8x32xf32>
    %172 = arith.addf %171, %170 : vector<8x32xf32>
    %173 = arith.divf %171, %172 : vector<8x32xf32>
    %174 = vector.extract_strided_slice %161 {offsets = [0, 64], sizes = [8, 32], strides = [1, 1]} : vector<8x128xf32> to vector<8x32xf32>
    %175 = math.tanh %174 : vector<8x32xf32>
    %176 = vector.extract_strided_slice %161 {offsets = [0, 96], sizes = [8, 32], strides = [1, 1]} : vector<8x128xf32> to vector<8x32xf32>
    %177 = arith.negf %176 : vector<8x32xf32>
    %178 = math.exp %177 : vector<8x32xf32>
    %cst_35 = arith.constant 1.000000e+00 : f32
    %179 = vector.broadcast %cst_35 : f32 to vector<8x32xf32>
    %180 = arith.addf %179, %178 : vector<8x32xf32>
    %181 = arith.divf %179, %180 : vector<8x32xf32>
    %182 = arith.mulf %173, %155 : vector<8x32xf32>
    %183 = arith.mulf %167, %175 : vector<8x32xf32>
    %184 = arith.addf %182, %183 : vector<8x32xf32>
    %185 = math.tanh %184 : vector<8x32xf32>
    %186 = arith.mulf %181, %185 : vector<8x32xf32>
    %187 = vector.extract_strided_slice %9 {offsets = [48, 0], sizes = [8, 128], strides = [1, 1]} : vector<64x128xf32> to vector<8x128xf32>
    %188 = arith.truncf %186 : vector<8x32xf32> to vector<8x32xbf16>
    %cst_36 = arith.constant dense<0.000000e+00> : vector<8x128xf32>
    %189 = tpu.matmul %188, %10, %cst_36 {dimension_numbers = #tpu.dot_dimension_numbers<[1], [0], [0], [1], [0, 0, 1, 1], [], []>} : vector<8x32xbf16>, vector<32x128xbf16>, vector<8x128xf32> -> vector<8x128xf32>
    %190 = arith.addf %187, %189 : vector<8x128xf32>
    %191 = vector.extract_strided_slice %190 {offsets = [0, 0], sizes = [8, 32], strides = [1, 1]} : vector<8x128xf32> to vector<8x32xf32>
    %192 = arith.negf %191 : vector<8x32xf32>
    %193 = math.exp %192 : vector<8x32xf32>
    %cst_37 = arith.constant 1.000000e+00 : f32
    %194 = vector.broadcast %cst_37 : f32 to vector<8x32xf32>
    %195 = arith.addf %194, %193 : vector<8x32xf32>
    %196 = arith.divf %194, %195 : vector<8x32xf32>
    %197 = vector.extract_strided_slice %190 {offsets = [0, 32], sizes = [8, 32], strides = [1, 1]} : vector<8x128xf32> to vector<8x32xf32>
    %198 = arith.negf %197 : vector<8x32xf32>
    %199 = math.exp %198 : vector<8x32xf32>
    %cst_38 = arith.constant 1.000000e+00 : f32
    %200 = vector.broadcast %cst_38 : f32 to vector<8x32xf32>
    %201 = arith.addf %200, %199 : vector<8x32xf32>
    %202 = arith.divf %200, %201 : vector<8x32xf32>
    %203 = vector.extract_strided_slice %190 {offsets = [0, 64], sizes = [8, 32], strides = [1, 1]} : vector<8x128xf32> to vector<8x32xf32>
    %204 = math.tanh %203 : vector<8x32xf32>
    %205 = vector.extract_strided_slice %190 {offsets = [0, 96], sizes = [8, 32], strides = [1, 1]} : vector<8x128xf32> to vector<8x32xf32>
    %206 = arith.negf %205 : vector<8x32xf32>
    %207 = math.exp %206 : vector<8x32xf32>
    %cst_39 = arith.constant 1.000000e+00 : f32
    %208 = vector.broadcast %cst_39 : f32 to vector<8x32xf32>
    %209 = arith.addf %208, %207 : vector<8x32xf32>
    %210 = arith.divf %208, %209 : vector<8x32xf32>
    %211 = arith.mulf %202, %184 : vector<8x32xf32>
    %212 = arith.mulf %196, %204 : vector<8x32xf32>
    %213 = arith.addf %211, %212 : vector<8x32xf32>
    %214 = math.tanh %213 : vector<8x32xf32>
    %215 = arith.mulf %210, %214 : vector<8x32xf32>
    %216 = vector.extract_strided_slice %9 {offsets = [56, 0], sizes = [8, 128], strides = [1, 1]} : vector<64x128xf32> to vector<8x128xf32>
    %217 = arith.truncf %215 : vector<8x32xf32> to vector<8x32xbf16>
    %cst_40 = arith.constant dense<0.000000e+00> : vector<8x128xf32>
    %218 = tpu.matmul %217, %10, %cst_40 {dimension_numbers = #tpu.dot_dimension_numbers<[1], [0], [0], [1], [0, 0, 1, 1], [], []>} : vector<8x32xbf16>, vector<32x128xbf16>, vector<8x128xf32> -> vector<8x128xf32>
    %219 = arith.addf %216, %218 : vector<8x128xf32>
    %220 = vector.extract_strided_slice %219 {offsets = [0, 0], sizes = [8, 32], strides = [1, 1]} : vector<8x128xf32> to vector<8x32xf32>
    %221 = arith.negf %220 : vector<8x32xf32>
    %222 = math.exp %221 : vector<8x32xf32>
    %cst_41 = arith.constant 1.000000e+00 : f32
    %223 = vector.broadcast %cst_41 : f32 to vector<8x32xf32>
    %224 = arith.addf %223, %222 : vector<8x32xf32>
    %225 = arith.divf %223, %224 : vector<8x32xf32>
    %226 = vector.extract_strided_slice %219 {offsets = [0, 32], sizes = [8, 32], strides = [1, 1]} : vector<8x128xf32> to vector<8x32xf32>
    %227 = arith.negf %226 : vector<8x32xf32>
    %228 = math.exp %227 : vector<8x32xf32>
    %cst_42 = arith.constant 1.000000e+00 : f32
    %229 = vector.broadcast %cst_42 : f32 to vector<8x32xf32>
    %230 = arith.addf %229, %228 : vector<8x32xf32>
    %231 = arith.divf %229, %230 : vector<8x32xf32>
    %232 = vector.extract_strided_slice %219 {offsets = [0, 64], sizes = [8, 32], strides = [1, 1]} : vector<8x128xf32> to vector<8x32xf32>
    %233 = math.tanh %232 : vector<8x32xf32>
    %234 = vector.extract_strided_slice %219 {offsets = [0, 96], sizes = [8, 32], strides = [1, 1]} : vector<8x128xf32> to vector<8x32xf32>
    %235 = arith.negf %234 : vector<8x32xf32>
    %236 = math.exp %235 : vector<8x32xf32>
    %cst_43 = arith.constant 1.000000e+00 : f32
    %237 = vector.broadcast %cst_43 : f32 to vector<8x32xf32>
    %238 = arith.addf %237, %236 : vector<8x32xf32>
    %239 = arith.divf %237, %238 : vector<8x32xf32>
    %240 = arith.mulf %231, %213 : vector<8x32xf32>
    %241 = arith.mulf %225, %233 : vector<8x32xf32>
    %242 = arith.addf %240, %241 : vector<8x32xf32>
    %243 = math.tanh %242 : vector<8x32xf32>
    %244 = arith.mulf %239, %243 : vector<8x32xf32>
    %c0_44 = arith.constant 0 : index
    %c0_45 = arith.constant 0 : index
    %245 = vector.load %arg6[%c0_44, %c0_45] : memref<8x32xf32, #tpu.memory_space<vmem>>, vector<8x32xf32>
    tpu.vector_store %arg6[%c0_44, %c0_45], %244 {strides = array<i32>} : memref<8x32xf32, #tpu.memory_space<vmem>>, vector<8x32xf32>,
    %c0_46 = arith.constant 0 : index
    %c0_47 = arith.constant 0 : index
    %246 = vector.load %arg7[%c0_46, %c0_47] : memref<8x32xf32, #tpu.memory_space<vmem>>, vector<8x32xf32>
    tpu.vector_store %arg7[%c0_46, %c0_47], %242 {strides = array<i32>} : memref<8x32xf32, #tpu.memory_space<vmem>>, vector<8x32xf32>,
    %247 = tpu.concatenate %41, %70, %99, %128, %157, %186, %215, %244 in 0 : vector<8x32xf32>, vector<8x32xf32>, vector<8x32xf32>, vector<8x32xf32>, vector<8x32xf32>, vector<8x32xf32>, vector<8x32xf32>, vector<8x32xf32> -> vector<64x32xf32>
    %248 = arith.truncf %247 : vector<64x32xf32> to vector<64x32xbf16>
    %c0_48 = arith.constant 0 : index
    %c0_49 = arith.constant 0 : index
    %249 = vector.load %arg5[%c0_48, %c0_49] : memref<64x32xbf16, #tpu.memory_space<vmem>>, vector<64x32xbf16>
    tpu.vector_store %arg5[%c0_48, %c0_49], %248 {strides = array<i32>} : memref<64x32xbf16, #tpu.memory_space<vmem>>, vector<64x32xbf16>,
    return
  }
  func.func @transform_0(%arg0: i32) -> (i32, i32) {
    %c0_i32 = arith.constant 0 : i32
    %c0_i32_0 = arith.constant 0 : i32
    return %arg0, %c0_i32 : i32, i32
  }
  func.func @transform_1(%arg0: i32) -> (i32, i32) {
    %c0_i32 = arith.constant 0 : i32
    %c0_i32_0 = arith.constant 0 : i32
    %c0_i32_1 = arith.constant 0 : i32
    return %c0_i32, %c0_i32_0 : i32, i32
  }
  func.func @transform_2(%arg0: i32) -> (i32, i32) {
    %c0_i32 = arith.constant 0 : i32
    %c0_i32_0 = arith.constant 0 : i32
    %c0_i32_1 = arith.constant 0 : i32
    return %c0_i32, %c0_i32_0 : i32, i32
  }
  func.func @transform_3(%arg0: i32) -> (i32, i32) {
    %c0_i32 = arith.constant 0 : i32
    %c0_i32_0 = arith.constant 0 : i32
    %c0_i32_1 = arith.constant 0 : i32
    return %c0_i32, %c0_i32_0 : i32, i32
  }
  func.func @transform_4(%arg0: i32) -> (i32, i32) {
    %c0_i32 = arith.constant 0 : i32
    %c0_i32_0 = arith.constant 0 : i32
    return %arg0, %c0_i32 : i32, i32
  }
}

module attributes {stable_mosaic.version = 11 : i64} {
  func.func @_lstm_block_kernel(%arg0: i32, %arg1: memref<64x32xbf16, #tpu.memory_space<vmem>>, %arg2: memref<32x128xbf16, #tpu.memory_space<vmem>>, %arg3: memref<32x128xbf16, #tpu.memory_space<vmem>>, %arg4: memref<1x128xf32, #tpu.memory_space<vmem>>, %arg5: memref<8x32xf32, #tpu.memory_space<vmem>>, %arg6: memref<8x32xf32, #tpu.memory_space<vmem>>, %arg7: memref<8x32xf32, #tpu.memory_space<vmem>>) attributes {dimension_semantics = [#tpu.dimension_semantics<arbitrary>], iteration_bounds = array<i64: 1>, scalar_prefetch = 0 : i64, scratch_operands = 2 : i64, tpu.core_type = #tpu.core_type<tc>, window_params = [{transform_indices = @transform_0, window_bounds = array<i64: 64, 32>}, {pipeline_mode = #tpu.pipeline_mode<synchronous>, transform_indices = @transform_1, window_bounds = array<i64: 32, 128>}, {pipeline_mode = #tpu.pipeline_mode<synchronous>, transform_indices = @transform_2, window_bounds = array<i64: 32, 128>}, {pipeline_mode = #tpu.pipeline_mode<synchronous>, transform_indices = @transform_3, window_bounds = array<i64: 1, 128>}, {pipeline_mode = #tpu.pipeline_mode<synchronous>, transform_indices = @transform_4, window_bounds = array<i64: 8, 32>}]} {
    %c0_i32 = arith.constant 0 : i32
    %0 = arith.cmpi eq, %arg0, %c0_i32 : i32
    %1 = arith.extui %0 : i1 to i32
    %c0_i32_0 = arith.constant 0 : i32
    %2 = arith.cmpi ne, %1, %c0_i32_0 : i32
    scf.if %2 {
      %cst_50 = arith.constant 0.000000e+00 : f32
      %249 = vector.broadcast %cst_50 : f32 to vector<8x32xf32>
      %c0_51 = arith.constant 0 : index
      %c0_52 = arith.constant 0 : index
      %250 = vector.load %arg6[%c0_51, %c0_52] : memref<8x32xf32, #tpu.memory_space<vmem>>, vector<8x32xf32>
      tpu.vector_store %arg6[%c0_51, %c0_52], %249 {strides = array<i32>} : memref<8x32xf32, #tpu.memory_space<vmem>>, vector<8x32xf32>,
      %cst_53 = arith.constant 0.000000e+00 : f32
      %251 = vector.broadcast %cst_53 : f32 to vector<8x32xf32>
      %c0_54 = arith.constant 0 : index
      %c0_55 = arith.constant 0 : index
      %252 = vector.load %arg7[%c0_54, %c0_55] : memref<8x32xf32, #tpu.memory_space<vmem>>, vector<8x32xf32>
      tpu.vector_store %arg7[%c0_54, %c0_55], %251 {strides = array<i32>} : memref<8x32xf32, #tpu.memory_space<vmem>>, vector<8x32xf32>,
    } else {
    }
    %c0 = arith.constant 0 : index
    %c0_1 = arith.constant 0 : index
    %3 = vector.load %arg1[%c0, %c0_1] : memref<64x32xbf16, #tpu.memory_space<vmem>>, vector<64x32xbf16>
    %c0_2 = arith.constant 0 : index
    %c0_3 = arith.constant 0 : index
    %4 = vector.load %arg2[%c0_2, %c0_3] : memref<32x128xbf16, #tpu.memory_space<vmem>>, vector<32x128xbf16>
    %cst = arith.constant dense<0.000000e+00> : vector<64x128xf32>
    %5 = tpu.matmul %3, %4, %cst {dimension_numbers = #tpu.dot_dimension_numbers<[1], [0], [0], [1], [0, 0, 1, 1], [], []>} : vector<64x32xbf16>, vector<32x128xbf16>, vector<64x128xf32> -> vector<64x128xf32>
    %c0_4 = arith.constant 0 : index
    %c0_5 = arith.constant 0 : index
    %6 = vector.load %arg4[%c0_4, %c0_5] : memref<1x128xf32, #tpu.memory_space<vmem>>, vector<1x128xf32>
    %7 = vector.broadcast %6 : vector<1x128xf32> to vector<64x128xf32>
    %8 = arith.addf %5, %7 : vector<64x128xf32>
    %c0_6 = arith.constant 0 : index
    %c0_7 = arith.constant 0 : index
    %9 = vector.load %arg3[%c0_6, %c0_7] : memref<32x128xbf16, #tpu.memory_space<vmem>>, vector<32x128xbf16>
    %c0_8 = arith.constant 0 : index
    %c0_9 = arith.constant 0 : index
    %10 = vector.load %arg6[%c0_8, %c0_9] : memref<8x32xf32, #tpu.memory_space<vmem>>, vector<8x32xf32>
    %c0_10 = arith.constant 0 : index
    %c0_11 = arith.constant 0 : index
    %11 = vector.load %arg7[%c0_10, %c0_11] : memref<8x32xf32, #tpu.memory_space<vmem>>, vector<8x32xf32>
    %12 = vector.extract_strided_slice %8 {offsets = [0, 0], sizes = [8, 128], strides = [1, 1]} : vector<64x128xf32> to vector<8x128xf32>
    %13 = arith.truncf %10 : vector<8x32xf32> to vector<8x32xbf16>
    %cst_12 = arith.constant dense<0.000000e+00> : vector<8x128xf32>
    %14 = tpu.matmul %13, %9, %cst_12 {dimension_numbers = #tpu.dot_dimension_numbers<[1], [0], [0], [1], [0, 0, 1, 1], [], []>} : vector<8x32xbf16>, vector<32x128xbf16>, vector<8x128xf32> -> vector<8x128xf32>
    %15 = arith.addf %12, %14 : vector<8x128xf32>
    %16 = vector.extract_strided_slice %15 {offsets = [0, 0], sizes = [8, 32], strides = [1, 1]} : vector<8x128xf32> to vector<8x32xf32>
    %17 = arith.negf %16 : vector<8x32xf32>
    %18 = math.exp %17 : vector<8x32xf32>
    %cst_13 = arith.constant 1.000000e+00 : f32
    %19 = vector.broadcast %cst_13 : f32 to vector<8x32xf32>
    %20 = arith.addf %19, %18 : vector<8x32xf32>
    %21 = arith.divf %19, %20 : vector<8x32xf32>
    %22 = vector.extract_strided_slice %15 {offsets = [0, 32], sizes = [8, 32], strides = [1, 1]} : vector<8x128xf32> to vector<8x32xf32>
    %23 = arith.negf %22 : vector<8x32xf32>
    %24 = math.exp %23 : vector<8x32xf32>
    %cst_14 = arith.constant 1.000000e+00 : f32
    %25 = vector.broadcast %cst_14 : f32 to vector<8x32xf32>
    %26 = arith.addf %25, %24 : vector<8x32xf32>
    %27 = arith.divf %25, %26 : vector<8x32xf32>
    %28 = vector.extract_strided_slice %15 {offsets = [0, 64], sizes = [8, 32], strides = [1, 1]} : vector<8x128xf32> to vector<8x32xf32>
    %29 = math.tanh %28 : vector<8x32xf32>
    %30 = vector.extract_strided_slice %15 {offsets = [0, 96], sizes = [8, 32], strides = [1, 1]} : vector<8x128xf32> to vector<8x32xf32>
    %31 = arith.negf %30 : vector<8x32xf32>
    %32 = math.exp %31 : vector<8x32xf32>
    %cst_15 = arith.constant 1.000000e+00 : f32
    %33 = vector.broadcast %cst_15 : f32 to vector<8x32xf32>
    %34 = arith.addf %33, %32 : vector<8x32xf32>
    %35 = arith.divf %33, %34 : vector<8x32xf32>
    %36 = arith.mulf %27, %11 : vector<8x32xf32>
    %37 = arith.mulf %21, %29 : vector<8x32xf32>
    %38 = arith.addf %36, %37 : vector<8x32xf32>
    %39 = math.tanh %38 : vector<8x32xf32>
    %40 = arith.mulf %35, %39 : vector<8x32xf32>
    %41 = vector.extract_strided_slice %8 {offsets = [8, 0], sizes = [8, 128], strides = [1, 1]} : vector<64x128xf32> to vector<8x128xf32>
    %42 = arith.truncf %40 : vector<8x32xf32> to vector<8x32xbf16>
    %cst_16 = arith.constant dense<0.000000e+00> : vector<8x128xf32>
    %43 = tpu.matmul %42, %9, %cst_16 {dimension_numbers = #tpu.dot_dimension_numbers<[1], [0], [0], [1], [0, 0, 1, 1], [], []>} : vector<8x32xbf16>, vector<32x128xbf16>, vector<8x128xf32> -> vector<8x128xf32>
    %44 = arith.addf %41, %43 : vector<8x128xf32>
    %45 = vector.extract_strided_slice %44 {offsets = [0, 0], sizes = [8, 32], strides = [1, 1]} : vector<8x128xf32> to vector<8x32xf32>
    %46 = arith.negf %45 : vector<8x32xf32>
    %47 = math.exp %46 : vector<8x32xf32>
    %cst_17 = arith.constant 1.000000e+00 : f32
    %48 = vector.broadcast %cst_17 : f32 to vector<8x32xf32>
    %49 = arith.addf %48, %47 : vector<8x32xf32>
    %50 = arith.divf %48, %49 : vector<8x32xf32>
    %51 = vector.extract_strided_slice %44 {offsets = [0, 32], sizes = [8, 32], strides = [1, 1]} : vector<8x128xf32> to vector<8x32xf32>
    %52 = arith.negf %51 : vector<8x32xf32>
    %53 = math.exp %52 : vector<8x32xf32>
    %cst_18 = arith.constant 1.000000e+00 : f32
    %54 = vector.broadcast %cst_18 : f32 to vector<8x32xf32>
    %55 = arith.addf %54, %53 : vector<8x32xf32>
    %56 = arith.divf %54, %55 : vector<8x32xf32>
    %57 = vector.extract_strided_slice %44 {offsets = [0, 64], sizes = [8, 32], strides = [1, 1]} : vector<8x128xf32> to vector<8x32xf32>
    %58 = math.tanh %57 : vector<8x32xf32>
    %59 = vector.extract_strided_slice %44 {offsets = [0, 96], sizes = [8, 32], strides = [1, 1]} : vector<8x128xf32> to vector<8x32xf32>
    %60 = arith.negf %59 : vector<8x32xf32>
    %61 = math.exp %60 : vector<8x32xf32>
    %cst_19 = arith.constant 1.000000e+00 : f32
    %62 = vector.broadcast %cst_19 : f32 to vector<8x32xf32>
    %63 = arith.addf %62, %61 : vector<8x32xf32>
    %64 = arith.divf %62, %63 : vector<8x32xf32>
    %65 = arith.mulf %56, %38 : vector<8x32xf32>
    %66 = arith.mulf %50, %58 : vector<8x32xf32>
    %67 = arith.addf %65, %66 : vector<8x32xf32>
    %68 = math.tanh %67 : vector<8x32xf32>
    %69 = arith.mulf %64, %68 : vector<8x32xf32>
    %70 = vector.extract_strided_slice %8 {offsets = [16, 0], sizes = [8, 128], strides = [1, 1]} : vector<64x128xf32> to vector<8x128xf32>
    %71 = arith.truncf %69 : vector<8x32xf32> to vector<8x32xbf16>
    %cst_20 = arith.constant dense<0.000000e+00> : vector<8x128xf32>
    %72 = tpu.matmul %71, %9, %cst_20 {dimension_numbers = #tpu.dot_dimension_numbers<[1], [0], [0], [1], [0, 0, 1, 1], [], []>} : vector<8x32xbf16>, vector<32x128xbf16>, vector<8x128xf32> -> vector<8x128xf32>
    %73 = arith.addf %70, %72 : vector<8x128xf32>
    %74 = vector.extract_strided_slice %73 {offsets = [0, 0], sizes = [8, 32], strides = [1, 1]} : vector<8x128xf32> to vector<8x32xf32>
    %75 = arith.negf %74 : vector<8x32xf32>
    %76 = math.exp %75 : vector<8x32xf32>
    %cst_21 = arith.constant 1.000000e+00 : f32
    %77 = vector.broadcast %cst_21 : f32 to vector<8x32xf32>
    %78 = arith.addf %77, %76 : vector<8x32xf32>
    %79 = arith.divf %77, %78 : vector<8x32xf32>
    %80 = vector.extract_strided_slice %73 {offsets = [0, 32], sizes = [8, 32], strides = [1, 1]} : vector<8x128xf32> to vector<8x32xf32>
    %81 = arith.negf %80 : vector<8x32xf32>
    %82 = math.exp %81 : vector<8x32xf32>
    %cst_22 = arith.constant 1.000000e+00 : f32
    %83 = vector.broadcast %cst_22 : f32 to vector<8x32xf32>
    %84 = arith.addf %83, %82 : vector<8x32xf32>
    %85 = arith.divf %83, %84 : vector<8x32xf32>
    %86 = vector.extract_strided_slice %73 {offsets = [0, 64], sizes = [8, 32], strides = [1, 1]} : vector<8x128xf32> to vector<8x32xf32>
    %87 = math.tanh %86 : vector<8x32xf32>
    %88 = vector.extract_strided_slice %73 {offsets = [0, 96], sizes = [8, 32], strides = [1, 1]} : vector<8x128xf32> to vector<8x32xf32>
    %89 = arith.negf %88 : vector<8x32xf32>
    %90 = math.exp %89 : vector<8x32xf32>
    %cst_23 = arith.constant 1.000000e+00 : f32
    %91 = vector.broadcast %cst_23 : f32 to vector<8x32xf32>
    %92 = arith.addf %91, %90 : vector<8x32xf32>
    %93 = arith.divf %91, %92 : vector<8x32xf32>
    %94 = arith.mulf %85, %67 : vector<8x32xf32>
    %95 = arith.mulf %79, %87 : vector<8x32xf32>
    %96 = arith.addf %94, %95 : vector<8x32xf32>
    %97 = math.tanh %96 : vector<8x32xf32>
    %98 = arith.mulf %93, %97 : vector<8x32xf32>
    %99 = vector.extract_strided_slice %8 {offsets = [24, 0], sizes = [8, 128], strides = [1, 1]} : vector<64x128xf32> to vector<8x128xf32>
    %100 = arith.truncf %98 : vector<8x32xf32> to vector<8x32xbf16>
    %cst_24 = arith.constant dense<0.000000e+00> : vector<8x128xf32>
    %101 = tpu.matmul %100, %9, %cst_24 {dimension_numbers = #tpu.dot_dimension_numbers<[1], [0], [0], [1], [0, 0, 1, 1], [], []>} : vector<8x32xbf16>, vector<32x128xbf16>, vector<8x128xf32> -> vector<8x128xf32>
    %102 = arith.addf %99, %101 : vector<8x128xf32>
    %103 = vector.extract_strided_slice %102 {offsets = [0, 0], sizes = [8, 32], strides = [1, 1]} : vector<8x128xf32> to vector<8x32xf32>
    %104 = arith.negf %103 : vector<8x32xf32>
    %105 = math.exp %104 : vector<8x32xf32>
    %cst_25 = arith.constant 1.000000e+00 : f32
    %106 = vector.broadcast %cst_25 : f32 to vector<8x32xf32>
    %107 = arith.addf %106, %105 : vector<8x32xf32>
    %108 = arith.divf %106, %107 : vector<8x32xf32>
    %109 = vector.extract_strided_slice %102 {offsets = [0, 32], sizes = [8, 32], strides = [1, 1]} : vector<8x128xf32> to vector<8x32xf32>
    %110 = arith.negf %109 : vector<8x32xf32>
    %111 = math.exp %110 : vector<8x32xf32>
    %cst_26 = arith.constant 1.000000e+00 : f32
    %112 = vector.broadcast %cst_26 : f32 to vector<8x32xf32>
    %113 = arith.addf %112, %111 : vector<8x32xf32>
    %114 = arith.divf %112, %113 : vector<8x32xf32>
    %115 = vector.extract_strided_slice %102 {offsets = [0, 64], sizes = [8, 32], strides = [1, 1]} : vector<8x128xf32> to vector<8x32xf32>
    %116 = math.tanh %115 : vector<8x32xf32>
    %117 = vector.extract_strided_slice %102 {offsets = [0, 96], sizes = [8, 32], strides = [1, 1]} : vector<8x128xf32> to vector<8x32xf32>
    %118 = arith.negf %117 : vector<8x32xf32>
    %119 = math.exp %118 : vector<8x32xf32>
    %cst_27 = arith.constant 1.000000e+00 : f32
    %120 = vector.broadcast %cst_27 : f32 to vector<8x32xf32>
    %121 = arith.addf %120, %119 : vector<8x32xf32>
    %122 = arith.divf %120, %121 : vector<8x32xf32>
    %123 = arith.mulf %114, %96 : vector<8x32xf32>
    %124 = arith.mulf %108, %116 : vector<8x32xf32>
    %125 = arith.addf %123, %124 : vector<8x32xf32>
    %126 = math.tanh %125 : vector<8x32xf32>
    %127 = arith.mulf %122, %126 : vector<8x32xf32>
    %128 = vector.extract_strided_slice %8 {offsets = [32, 0], sizes = [8, 128], strides = [1, 1]} : vector<64x128xf32> to vector<8x128xf32>
    %129 = arith.truncf %127 : vector<8x32xf32> to vector<8x32xbf16>
    %cst_28 = arith.constant dense<0.000000e+00> : vector<8x128xf32>
    %130 = tpu.matmul %129, %9, %cst_28 {dimension_numbers = #tpu.dot_dimension_numbers<[1], [0], [0], [1], [0, 0, 1, 1], [], []>} : vector<8x32xbf16>, vector<32x128xbf16>, vector<8x128xf32> -> vector<8x128xf32>
    %131 = arith.addf %128, %130 : vector<8x128xf32>
    %132 = vector.extract_strided_slice %131 {offsets = [0, 0], sizes = [8, 32], strides = [1, 1]} : vector<8x128xf32> to vector<8x32xf32>
    %133 = arith.negf %132 : vector<8x32xf32>
    %134 = math.exp %133 : vector<8x32xf32>
    %cst_29 = arith.constant 1.000000e+00 : f32
    %135 = vector.broadcast %cst_29 : f32 to vector<8x32xf32>
    %136 = arith.addf %135, %134 : vector<8x32xf32>
    %137 = arith.divf %135, %136 : vector<8x32xf32>
    %138 = vector.extract_strided_slice %131 {offsets = [0, 32], sizes = [8, 32], strides = [1, 1]} : vector<8x128xf32> to vector<8x32xf32>
    %139 = arith.negf %138 : vector<8x32xf32>
    %140 = math.exp %139 : vector<8x32xf32>
    %cst_30 = arith.constant 1.000000e+00 : f32
    %141 = vector.broadcast %cst_30 : f32 to vector<8x32xf32>
    %142 = arith.addf %141, %140 : vector<8x32xf32>
    %143 = arith.divf %141, %142 : vector<8x32xf32>
    %144 = vector.extract_strided_slice %131 {offsets = [0, 64], sizes = [8, 32], strides = [1, 1]} : vector<8x128xf32> to vector<8x32xf32>
    %145 = math.tanh %144 : vector<8x32xf32>
    %146 = vector.extract_strided_slice %131 {offsets = [0, 96], sizes = [8, 32], strides = [1, 1]} : vector<8x128xf32> to vector<8x32xf32>
    %147 = arith.negf %146 : vector<8x32xf32>
    %148 = math.exp %147 : vector<8x32xf32>
    %cst_31 = arith.constant 1.000000e+00 : f32
    %149 = vector.broadcast %cst_31 : f32 to vector<8x32xf32>
    %150 = arith.addf %149, %148 : vector<8x32xf32>
    %151 = arith.divf %149, %150 : vector<8x32xf32>
    %152 = arith.mulf %143, %125 : vector<8x32xf32>
    %153 = arith.mulf %137, %145 : vector<8x32xf32>
    %154 = arith.addf %152, %153 : vector<8x32xf32>
    %155 = math.tanh %154 : vector<8x32xf32>
    %156 = arith.mulf %151, %155 : vector<8x32xf32>
    %157 = vector.extract_strided_slice %8 {offsets = [40, 0], sizes = [8, 128], strides = [1, 1]} : vector<64x128xf32> to vector<8x128xf32>
    %158 = arith.truncf %156 : vector<8x32xf32> to vector<8x32xbf16>
    %cst_32 = arith.constant dense<0.000000e+00> : vector<8x128xf32>
    %159 = tpu.matmul %158, %9, %cst_32 {dimension_numbers = #tpu.dot_dimension_numbers<[1], [0], [0], [1], [0, 0, 1, 1], [], []>} : vector<8x32xbf16>, vector<32x128xbf16>, vector<8x128xf32> -> vector<8x128xf32>
    %160 = arith.addf %157, %159 : vector<8x128xf32>
    %161 = vector.extract_strided_slice %160 {offsets = [0, 0], sizes = [8, 32], strides = [1, 1]} : vector<8x128xf32> to vector<8x32xf32>
    %162 = arith.negf %161 : vector<8x32xf32>
    %163 = math.exp %162 : vector<8x32xf32>
    %cst_33 = arith.constant 1.000000e+00 : f32
    %164 = vector.broadcast %cst_33 : f32 to vector<8x32xf32>
    %165 = arith.addf %164, %163 : vector<8x32xf32>
    %166 = arith.divf %164, %165 : vector<8x32xf32>
    %167 = vector.extract_strided_slice %160 {offsets = [0, 32], sizes = [8, 32], strides = [1, 1]} : vector<8x128xf32> to vector<8x32xf32>
    %168 = arith.negf %167 : vector<8x32xf32>
    %169 = math.exp %168 : vector<8x32xf32>
    %cst_34 = arith.constant 1.000000e+00 : f32
    %170 = vector.broadcast %cst_34 : f32 to vector<8x32xf32>
    %171 = arith.addf %170, %169 : vector<8x32xf32>
    %172 = arith.divf %170, %171 : vector<8x32xf32>
    %173 = vector.extract_strided_slice %160 {offsets = [0, 64], sizes = [8, 32], strides = [1, 1]} : vector<8x128xf32> to vector<8x32xf32>
    %174 = math.tanh %173 : vector<8x32xf32>
    %175 = vector.extract_strided_slice %160 {offsets = [0, 96], sizes = [8, 32], strides = [1, 1]} : vector<8x128xf32> to vector<8x32xf32>
    %176 = arith.negf %175 : vector<8x32xf32>
    %177 = math.exp %176 : vector<8x32xf32>
    %cst_35 = arith.constant 1.000000e+00 : f32
    %178 = vector.broadcast %cst_35 : f32 to vector<8x32xf32>
    %179 = arith.addf %178, %177 : vector<8x32xf32>
    %180 = arith.divf %178, %179 : vector<8x32xf32>
    %181 = arith.mulf %172, %154 : vector<8x32xf32>
    %182 = arith.mulf %166, %174 : vector<8x32xf32>
    %183 = arith.addf %181, %182 : vector<8x32xf32>
    %184 = math.tanh %183 : vector<8x32xf32>
    %185 = arith.mulf %180, %184 : vector<8x32xf32>
    %186 = vector.extract_strided_slice %8 {offsets = [48, 0], sizes = [8, 128], strides = [1, 1]} : vector<64x128xf32> to vector<8x128xf32>
    %187 = arith.truncf %185 : vector<8x32xf32> to vector<8x32xbf16>
    %cst_36 = arith.constant dense<0.000000e+00> : vector<8x128xf32>
    %188 = tpu.matmul %187, %9, %cst_36 {dimension_numbers = #tpu.dot_dimension_numbers<[1], [0], [0], [1], [0, 0, 1, 1], [], []>} : vector<8x32xbf16>, vector<32x128xbf16>, vector<8x128xf32> -> vector<8x128xf32>
    %189 = arith.addf %186, %188 : vector<8x128xf32>
    %190 = vector.extract_strided_slice %189 {offsets = [0, 0], sizes = [8, 32], strides = [1, 1]} : vector<8x128xf32> to vector<8x32xf32>
    %191 = arith.negf %190 : vector<8x32xf32>
    %192 = math.exp %191 : vector<8x32xf32>
    %cst_37 = arith.constant 1.000000e+00 : f32
    %193 = vector.broadcast %cst_37 : f32 to vector<8x32xf32>
    %194 = arith.addf %193, %192 : vector<8x32xf32>
    %195 = arith.divf %193, %194 : vector<8x32xf32>
    %196 = vector.extract_strided_slice %189 {offsets = [0, 32], sizes = [8, 32], strides = [1, 1]} : vector<8x128xf32> to vector<8x32xf32>
    %197 = arith.negf %196 : vector<8x32xf32>
    %198 = math.exp %197 : vector<8x32xf32>
    %cst_38 = arith.constant 1.000000e+00 : f32
    %199 = vector.broadcast %cst_38 : f32 to vector<8x32xf32>
    %200 = arith.addf %199, %198 : vector<8x32xf32>
    %201 = arith.divf %199, %200 : vector<8x32xf32>
    %202 = vector.extract_strided_slice %189 {offsets = [0, 64], sizes = [8, 32], strides = [1, 1]} : vector<8x128xf32> to vector<8x32xf32>
    %203 = math.tanh %202 : vector<8x32xf32>
    %204 = vector.extract_strided_slice %189 {offsets = [0, 96], sizes = [8, 32], strides = [1, 1]} : vector<8x128xf32> to vector<8x32xf32>
    %205 = arith.negf %204 : vector<8x32xf32>
    %206 = math.exp %205 : vector<8x32xf32>
    %cst_39 = arith.constant 1.000000e+00 : f32
    %207 = vector.broadcast %cst_39 : f32 to vector<8x32xf32>
    %208 = arith.addf %207, %206 : vector<8x32xf32>
    %209 = arith.divf %207, %208 : vector<8x32xf32>
    %210 = arith.mulf %201, %183 : vector<8x32xf32>
    %211 = arith.mulf %195, %203 : vector<8x32xf32>
    %212 = arith.addf %210, %211 : vector<8x32xf32>
    %213 = math.tanh %212 : vector<8x32xf32>
    %214 = arith.mulf %209, %213 : vector<8x32xf32>
    %215 = vector.extract_strided_slice %8 {offsets = [56, 0], sizes = [8, 128], strides = [1, 1]} : vector<64x128xf32> to vector<8x128xf32>
    %216 = arith.truncf %214 : vector<8x32xf32> to vector<8x32xbf16>
    %cst_40 = arith.constant dense<0.000000e+00> : vector<8x128xf32>
    %217 = tpu.matmul %216, %9, %cst_40 {dimension_numbers = #tpu.dot_dimension_numbers<[1], [0], [0], [1], [0, 0, 1, 1], [], []>} : vector<8x32xbf16>, vector<32x128xbf16>, vector<8x128xf32> -> vector<8x128xf32>
    %218 = arith.addf %215, %217 : vector<8x128xf32>
    %219 = vector.extract_strided_slice %218 {offsets = [0, 0], sizes = [8, 32], strides = [1, 1]} : vector<8x128xf32> to vector<8x32xf32>
    %220 = arith.negf %219 : vector<8x32xf32>
    %221 = math.exp %220 : vector<8x32xf32>
    %cst_41 = arith.constant 1.000000e+00 : f32
    %222 = vector.broadcast %cst_41 : f32 to vector<8x32xf32>
    %223 = arith.addf %222, %221 : vector<8x32xf32>
    %224 = arith.divf %222, %223 : vector<8x32xf32>
    %225 = vector.extract_strided_slice %218 {offsets = [0, 32], sizes = [8, 32], strides = [1, 1]} : vector<8x128xf32> to vector<8x32xf32>
    %226 = arith.negf %225 : vector<8x32xf32>
    %227 = math.exp %226 : vector<8x32xf32>
    %cst_42 = arith.constant 1.000000e+00 : f32
    %228 = vector.broadcast %cst_42 : f32 to vector<8x32xf32>
    %229 = arith.addf %228, %227 : vector<8x32xf32>
    %230 = arith.divf %228, %229 : vector<8x32xf32>
    %231 = vector.extract_strided_slice %218 {offsets = [0, 64], sizes = [8, 32], strides = [1, 1]} : vector<8x128xf32> to vector<8x32xf32>
    %232 = math.tanh %231 : vector<8x32xf32>
    %233 = vector.extract_strided_slice %218 {offsets = [0, 96], sizes = [8, 32], strides = [1, 1]} : vector<8x128xf32> to vector<8x32xf32>
    %234 = arith.negf %233 : vector<8x32xf32>
    %235 = math.exp %234 : vector<8x32xf32>
    %cst_43 = arith.constant 1.000000e+00 : f32
    %236 = vector.broadcast %cst_43 : f32 to vector<8x32xf32>
    %237 = arith.addf %236, %235 : vector<8x32xf32>
    %238 = arith.divf %236, %237 : vector<8x32xf32>
    %239 = arith.mulf %230, %212 : vector<8x32xf32>
    %240 = arith.mulf %224, %232 : vector<8x32xf32>
    %241 = arith.addf %239, %240 : vector<8x32xf32>
    %242 = math.tanh %241 : vector<8x32xf32>
    %243 = arith.mulf %238, %242 : vector<8x32xf32>
    %c0_44 = arith.constant 0 : index
    %c0_45 = arith.constant 0 : index
    %244 = vector.load %arg6[%c0_44, %c0_45] : memref<8x32xf32, #tpu.memory_space<vmem>>, vector<8x32xf32>
    tpu.vector_store %arg6[%c0_44, %c0_45], %243 {strides = array<i32>} : memref<8x32xf32, #tpu.memory_space<vmem>>, vector<8x32xf32>,
    %c0_46 = arith.constant 0 : index
    %c0_47 = arith.constant 0 : index
    %245 = vector.load %arg7[%c0_46, %c0_47] : memref<8x32xf32, #tpu.memory_space<vmem>>, vector<8x32xf32>
    tpu.vector_store %arg7[%c0_46, %c0_47], %241 {strides = array<i32>} : memref<8x32xf32, #tpu.memory_space<vmem>>, vector<8x32xf32>,
    %c0_i32_48 = arith.constant 0 : i32
    %246 = arith.cmpi eq, %arg0, %c0_i32_48 : i32
    %247 = arith.extui %246 : i1 to i32
    %c0_i32_49 = arith.constant 0 : i32
    %248 = arith.cmpi ne, %247, %c0_i32_49 : i32
    scf.if %248 {
      %c0_50 = arith.constant 0 : index
      %c0_51 = arith.constant 0 : index
      %249 = vector.load %arg5[%c0_50, %c0_51] : memref<8x32xf32, #tpu.memory_space<vmem>>, vector<8x32xf32>
      tpu.vector_store %arg5[%c0_50, %c0_51], %243 {strides = array<i32>} : memref<8x32xf32, #tpu.memory_space<vmem>>, vector<8x32xf32>,
    } else {
    }
    return
  }
  func.func @transform_0(%arg0: i32) -> (i32, i32) {
    %c0_i32 = arith.constant 0 : i32
    %c0_i32_0 = arith.constant 0 : i32
    return %arg0, %c0_i32 : i32, i32
  }
  func.func @transform_1(%arg0: i32) -> (i32, i32) {
    %c0_i32 = arith.constant 0 : i32
    %c0_i32_0 = arith.constant 0 : i32
    %c0_i32_1 = arith.constant 0 : i32
    return %c0_i32, %c0_i32_0 : i32, i32
  }
  func.func @transform_2(%arg0: i32) -> (i32, i32) {
    %c0_i32 = arith.constant 0 : i32
    %c0_i32_0 = arith.constant 0 : i32
    %c0_i32_1 = arith.constant 0 : i32
    return %c0_i32, %c0_i32_0 : i32, i32
  }
  func.func @transform_3(%arg0: i32) -> (i32, i32) {
    %c0_i32 = arith.constant 0 : i32
    %c0_i32_0 = arith.constant 0 : i32
    %c0_i32_1 = arith.constant 0 : i32
    return %c0_i32, %c0_i32_0 : i32, i32
  }
  func.func @transform_4(%arg0: i32) -> (i32, i32) {
    %c0_i32 = arith.constant 0 : i32
    %c0_i32_0 = arith.constant 0 : i32
    %c0_i32_1 = arith.constant 0 : i32
    return %c0_i32, %c0_i32_0 : i32, i32
  }
}

</mosaic_0001>

<bundles_post_ra>
// kernel: rnn_forward.2
= control target key start
LH: loop header
LB: loop body
LE: loop exit
PB: predicated region body
PF: predicated region fallthrough
CT: control target
= control target key end

     0   :  { %vm58_vm0 = vcmask 1041408   ;;  %v1008_v1 = vmov 0.0   ;;  %vm1009_vm1 = vmmov 0   ;;  %vm45_vm2 = vcmask 31744   ;;  %s1010_s29 = smov 64   ;;  %s1011_s30 = smov 32   ;;  %s1269_s1 = inlined_call_operand.vmem [shape: bf16[4,128], index: 1, kind: input, shape index: {}]   ;;  %s1270_s2 = inlined_call_operand.vmem [shape: bf16[32,128], index: 2, kind: input, shape index: {}]   ;;  %s1271_s0 = inlined_call_operand.vmem [shape: f32[64,4], index: 0, kind: input, shape index: {}]   ;;  %s1272_s3 = inlined_call_operand.vmem [shape: f32[1,128], index: 3, kind: input, shape index: {}]   ;;  %s1273_s4 = inlined_call_operand.vmem [shape: bf16[64,32], index: 4, kind: output, shape index: {}]  }
   0x1   :  { %v37_v0 = vld [vmem:[%s1269_s1] sm:$0x3]  ;;  %872 = vmatprep.subr.bf16.mxu1 %v1008_v1  ;;  %876 = vmatprep.mubr.msk.bf16.mxu1 %vm1009_vm1, %v1008_v1  ;;  %v1047_v3 = vld [vmem:[%s1270_s2 + $0x8] sm:$0xff]   ;;  %vm22_vm3 = vcmask 261120   ;;  %v27_v7 = vld [vmem:[%s1271_s0 + $0x10] sm:$0xff]  ;;  %vm781_vm4 = vcmask 257024  }
   0x2   :  { %936 = vmatprep.subr.msk.bf16.mxu0 %vm58_vm0, %v37_v0  ;;  %v60_v2 = vsel %vm58_vm0, %v37_v0, 0  ;;  %v25_v4 = vld [vmem:[%s1271_s0] sm:$0xff]  ;;  %v26_v5 = vld [vmem:[%s1271_s0 + $0x8] sm:$0xff]  ;;  %v28_v8 = vld [vmem:[%s1271_s0 + $0x18] sm:$0xff]  ;;  %23 = vst.msk [vmem:[#allocation2] sm:$0xff] %vm22_vm3, %v1008_v1  ;;  %873 = vmatpush3.bf16.msra.mxu1 %v1047_v3  ;;  %s1012_s17 = smov 96  }
   0x3   :  { %863 = vmatpush3.bf16.msra.mxu0 %v60_v2  ;;  %v33_v6 = vpack.c.bf16 %v26_v5, %v25_v4  ;;  %24 = vst.msk [vmem:[#allocation3] sm:$0xff] %vm22_vm3, %v1008_v1  ;;  %v34_v9 = vpack.c.bf16 %v28_v8, %v27_v7  ;;  %v1069_v10 = vld [vmem:[%s1270_s2] sm:$0xff]   ;;  %874 = vmatprep.subr.bf16.mxu1 %v1008_v1  ;;  %v30_v58 = vld [vmem:[%s1271_s0 + $0x28] sm:$0xff]  ;;  %v31_v59 = vld [vmem:[%s1271_s0 + $0x30] sm:$0xff] }
   0x4   :  { %888 = vmatprep.subr.bf16.mxu0 %v1008_v1  ;;  %v1093_v14 = vld [vmem:[%s1272_s3] ss:$0 sm:$0xff]  ;;  %v32_v61 = vld [vmem:[%s1271_s0 + $0x38] sm:$0xff] }
   0x5   :  { %864 = vmatprep.mubr.msk.bf16.mxu0 %vm45_vm2, %v33_v6  ;;  %v29_v57 = vld [vmem:[%s1271_s0 + $0x20] sm:$0xff]  ;;  %v36_v62 = vpack.c.bf16 %v32_v61, %v31_v59 }
   0x6   :  { %865 = vmatmul.mubr.msk.bf16.vlgmr.msra.gmra.mxu0 %vm45_vm2, %v34_v9  ;;  %875 = vmatpush3.bf16.msra.mxu1 %v1069_v10  ;;  %v35_v60 = vpack.c.bf16 %v30_v58, %v29_v57 }
   0x7   :  { %889 = vmatpush3.bf16.msra.mxu0 %v1047_v3  ;;  %880 = vmatprep.subr.bf16.mxu1 %v1008_v1 }
   0x8   :  { %890 = vmatprep.subr.bf16.mxu0 %v1008_v1  ;;  %868 = vmatprep.mubr.msk.bf16.mxu0 %vm45_vm2, %v35_v60 }
   0x9   :  { %v131_v11 = vld [vmem:[#allocation2] sm:$0xff] }
   0xa   :  { %v133_v12 = vpack.c.bf16 %v131_v11, %v131_v11  ;;  %v132_v23 = vld [vmem:[#allocation3] sm:$0xff] }
   0xb   :  { %891 = vmatpush3.bf16.msra.mxu0 %v1069_v10 }
   0xc   :  { %904 = vmatprep.subr.bf16.mxu0 %v1008_v1  ;;  %877 = vmatmul.mubr.msk.bf16.vlgmr.msra.gmra.mxu1 %vm22_vm3, %v133_v12 }
   0xd   :  { %881 = vmatpush3.bf16.msra.mxu1 %v1047_v3  ;;  %884 = vmatprep.mubr.msk.bf16.mxu1 %vm1009_vm1, %v1008_v1 }
   0xe   :  { %882 = vmatprep.subr.bf16.mxu1 %v1008_v1  ;;  %869 = vmatmul.mubr.msk.bf16.gmra.mxu0 %vm45_vm2, %v36_v62 }
   0xf   :  { %892 = vmatprep.mubr.msk.bf16.mxu0 %vm1009_vm1, %v1008_v1 }
  0x11   :  { %883 = vmatpush3.bf16.msra.mxu1 %v1069_v10 }
  0x12   :  { %896 = vmatprep.subr.bf16.mxu1 %v1008_v1 }
  0xc6   :  { %v1088_v13 = vpop.f32.mrf.mxu0 }
  0xc7   :  { %v105_v11 = vadd.f32 %v1088_v13, %v1093_v14 }
  0xc8   :  { %v96_v15 = vpop.f32.mrf.mxu0 }
  0xc9   :  { %v97_v16 = vadd.f32 %v1093_v14, %v96_v15 }
  0xca   :  { %v1111_v39 = vpop.f32.mrf.mxu0 }
  0xcc   :  { %v184_v17 = vpop.f32.mrf.mxu1  ;;  %v99_v40 = vpop.f32.mrf.mxu0 }
  0xcd   :  { %v190_v18 = vadd.f32 %v184_v17, %v97_v16  ;;  %v100_v41 = vadd.f32 %v1093_v14, %v99_v40 }
  0xce   :  { %v878_v19 = vpop.f32.mrf.mxu1  ;;  %v1144_v6 = vpop.f32.mrf.mxu0 }
  0xcf   :  { %944 = vtanh.f32 %v190_v18  ;;  %v802_v24 = vmul.f32 -1.442695, %v190_v18 }
  0xd0   :  { %v187_v20 = vpop.f32.mrf.mxu1  ;;  %v1146_v7 = vpop.f32.mrf.mxu0 }
  0xd1   :  { %946 = vpow2.f32 %v802_v24 }
  0xd2   :  { %v879_v21 = vpop.f32.mrf.mxu1  ;;  %v1148_v8 = vpop.f32.mrf.mxu0 }
  0xd4   :  { %v1150_v9 = vpop.f32.mrf.mxu0 }
  0xdc   :  { %v945_v22 = vpop.eup %944 }
  0xdd   :  { %204 = vrot.lane.b32.xlu0 %v945_v22, %s1010_s29 }
  0xde   :  { %v947_v25 = vpop.eup %946 }
  0xdf   :  { %v194_v26 = vadd.f32 1.0, %v947_v25 }
  0xe1   :  { %199 = vrot.lane.b32.xlu0 %v132_v23, %s1011_s30  ;;  %948 = vrcp.f32 %v194_v26 }
  0xee   :  { %v949_v27 = vpop.eup %948 }
 0x14f   :  { %v205_v28 = vpop.permute.xlu0 %204 }
 0x150   :  { %v207_v29 = vmul.f32 %v949_v27, %v205_v28 }
 0x152   :  { %209 = vrot.lane.b32.xlu1 %v207_v29, %s1011_s30 }
 0x153   :  { %v200_v30 = vpop.permute.xlu0 %199 }
 0x154   :  { %v202_v31 = vmul.f32 %v949_v27, %v200_v30 }
 0x1c4   :  { %v210_v32 = vpop.permute.xlu1 %209 }
 0x1c5   :  { %v212_v33 = vadd.f32 %v210_v32, %v202_v31 }
 0x1c7   :  { %950 = vtanh.f32 %v212_v33 }
 0x1d4   :  { %v951_v34 = vpop.eup %950 }
 0x1d5   :  { %215 = vrot.lane.b32.xlu1 %v951_v34, %s1010_s29 }
 0x247   :  { %v216_v35 = vpop.permute.xlu1 %215 }
 0x248   :  { %v218_v36 = vmul.f32 %v949_v27, %v216_v35 }
 0x24a   :  { %v1100_v37 = vpack.c.bf16 %v218_v36, %v218_v36 }
 0x24c   :  { %221 = vrot.lane.b32.xlu0 %v1100_v37, %s1011_s30 }
 0x2be   :  { %v222_v38 = vpop.permute.xlu0 %221 }
 0x2bf   :  { %885 = vmatmul.mubr.msk.bf16.vlgmr.msra.gmra.mxu1 %vm22_vm3, %v222_v38 }
 0x2c0   :  { %897 = vmatpush3.bf16.msra.mxu1 %v1047_v3  ;;  %900 = vmatprep.mubr.msk.bf16.mxu1 %vm1009_vm1, %v1008_v1 }
 0x2c1   :  { %898 = vmatprep.subr.bf16.mxu1 %v1008_v1 }
 0x2c4   :  { %899 = vmatpush3.bf16.msra.mxu1 %v1069_v10 }
 0x2c5   :  { %912 = vmatprep.subr.bf16.mxu1 %v1008_v1 }
 0x37f   :  { %v260_v42 = vpop.f32.mrf.mxu1 }
 0x380   :  { %v266_v43 = vadd.f32 %v260_v42, %v100_v41 }
 0x381   :  { %v886_v44 = vpop.f32.mrf.mxu1 }
 0x382   :  { %952 = vtanh.f32 %v266_v43  ;;  %v804_v48 = vmul.f32 -1.442695, %v266_v43 }
 0x383   :  { %v263_v45 = vpop.f32.mrf.mxu1 }
 0x384   :  { %954 = vpow2.f32 %v804_v48 }
 0x385   :  { %v887_v46 = vpop.f32.mrf.mxu1 }
 0x38f   :  { %v953_v47 = vpop.eup %952 }
 0x390   :  { %276 = vrot.lane.b32.xlu1 %v953_v47, %s1010_s29 }
 0x391   :  { %v955_v49 = vpop.eup %954 }
 0x392   :  { %v270_v50 = vadd.f32 1.0, %v955_v49 }
 0x394   :  { %956 = vrcp.f32 %v270_v50 }
 0x3a1   :  { %v957_v51 = vpop.eup %956 }
 0x3a2   :  { %v274_v54 = vmul.f32 %v957_v51, %v212_v33  ;;  %v108_v33 = vadd.f32 %v1111_v39, %v1093_v14 }
 0x402   :  { %v277_v52 = vpop.permute.xlu1 %276 }
 0x403   :  { %v279_v53 = vmul.f32 %v957_v51, %v277_v52 }
 0x405   :  { %281 = vrot.lane.b32.xlu0 %v279_v53, %s1011_s30 }
 0x477   :  { %v282_v55 = vpop.permute.xlu0 %281 }
 0x478   :  { %v284_v56 = vadd.f32 %v282_v55, %v274_v54  ;;  %v113_v55 = vadd.f32 %v1093_v14, %v1146_v7 }
 0x47a   :  { %958 = vtanh.f32 %v284_v56 }
 0x487   :  { %v959_v63 = vpop.eup %958 }
 0x488   :  { %287 = vrot.lane.b32.xlu1 %v959_v63, %s1010_s29 }
 0x4fa   :  { %v288_v0 = vpop.permute.xlu1 %287 }
 0x4fb   :  { %v290_v2 = vmul.f32 %v957_v51, %v288_v0 }
 0x4fd   :  { %v1133_v4 = vpack.c.bf16 %v290_v2, %v290_v2 }
 0x4ff   :  { %293 = vrot.lane.b32.xlu0 %v1133_v4, %s1011_s30 }
 0x571   :  { %v294_v5 = vpop.permute.xlu0 %293 }
 0x572   :  { %893 = vmatmul.mubr.msk.bf16.vlgmr.msra.gmra.mxu0 %vm22_vm3, %v294_v5 }
 0x573   :  { %905 = vmatpush3.bf16.msra.mxu0 %v1047_v3  ;;  %908 = vmatprep.mubr.msk.bf16.mxu0 %vm1009_vm1, %v1008_v1 }
 0x574   :  { %906 = vmatprep.subr.bf16.mxu0 %v1008_v1 }
 0x577   :  { %907 = vmatpush3.bf16.msra.mxu0 %v1069_v10 }
 0x578   :  { %920 = vmatprep.subr.bf16.mxu0 %v1008_v1 }
 0x632   :  { %v332_v12 = vpop.f32.mrf.mxu0 }
 0x633   :  { %v338_v15 = vadd.f32 %v332_v12, %v105_v11 }
 0x634   :  { %v894_v16 = vpop.f32.mrf.mxu0 }
 0x635   :  { %960 = vtanh.f32 %v338_v15  ;;  %v806_v20 = vmul.f32 -1.442695, %v338_v15 }
 0x636   :  { %v335_v17 = vpop.f32.mrf.mxu0 }
 0x637   :  { %962 = vpow2.f32 %v806_v20 }
 0x638   :  { %v895_v18 = vpop.f32.mrf.mxu0 }
 0x642   :  { %v961_v19 = vpop.eup %960 }
 0x643   :  { %348 = vrot.lane.b32.xlu1 %v961_v19, %s1010_s29 }
 0x644   :  { %v963_v21 = vpop.eup %962 }
 0x645   :  { %v342_v22 = vadd.f32 1.0, %v963_v21  ;;  %v116_v21 = vadd.f32 %v1093_v14, %v1150_v9 }
 0x647   :  { %964 = vrcp.f32 %v342_v22 }
 0x654   :  { %v965_v23 = vpop.eup %964 }
 0x655   :  { %v346_v13 = vmul.f32 %v965_v23, %v284_v56 }
 0x6b5   :  { %v349_v24 = vpop.permute.xlu1 %348 }
 0x6b6   :  { %v351_v25 = vmul.f32 %v965_v23, %v349_v24 }
 0x6b8   :  { %353 = vrot.lane.b32.xlu0 %v351_v25, %s1011_s30 }
 0x72a   :  { %v354_v26 = vpop.permute.xlu0 %353 }
 0x72b   :  { %v356_v27 = vadd.f32 %v354_v26, %v346_v13 }
 0x72d   :  { %966 = vtanh.f32 %v356_v27 }
 0x73a   :  { %v967_v28 = vpop.eup %966 }
 0x73b   :  { %359 = vrot.lane.b32.xlu1 %v967_v28, %s1010_s29 }
 0x7ad   :  { %v360_v29 = vpop.permute.xlu1 %359 }
 0x7ae   :  { %v362_v30 = vmul.f32 %v965_v23, %v360_v29 }
 0x7b0   :  { %v1157_v31 = vpack.c.bf16 %v362_v30, %v362_v30 }
 0x7b2   :  { %365 = vrot.lane.b32.xlu0 %v1157_v31, %s1011_s30 }
 0x824   :  { %v366_v32 = vpop.permute.xlu0 %365 }
 0x825   :  { %901 = vmatmul.mubr.msk.bf16.vlgmr.msra.gmra.mxu1 %vm22_vm3, %v366_v32 }
 0x826   :  { %913 = vmatpush3.bf16.msra.mxu1 %v1047_v3  ;;  %916 = vmatprep.mubr.msk.bf16.mxu1 %vm1009_vm1, %v1008_v1 }
 0x827   :  { %914 = vmatprep.subr.bf16.mxu1 %v1008_v1 }
 0x82a   :  { %915 = vmatpush3.bf16.msra.mxu1 %v1069_v10 }
 0x82b   :  { %928 = vmatprep.subr.bf16.mxu1 %v1008_v1 }
 0x8e5   :  { %v404_v34 = vpop.f32.mrf.mxu1 }
 0x8e6   :  { %v410_v35 = vadd.f32 %v404_v34, %v108_v33 }
 0x8e7   :  { %v902_v36 = vpop.f32.mrf.mxu1 }
 0x8e8   :  { %968 = vtanh.f32 %v410_v35  ;;  %v808_v42 = vmul.f32 -1.442695, %v410_v35 }
 0x8e9   :  { %v407_v38 = vpop.f32.mrf.mxu1 }
 0x8ea   :  { %970 = vpow2.f32 %v808_v42 }
 0x8eb   :  { %v903_v40 = vpop.f32.mrf.mxu1 }
 0x8ec   :  { %v121_v40 = vadd.f32 %v1144_v6, %v1093_v14 }
 0x8f5   :  { %v969_v41 = vpop.eup %968 }
 0x8f6   :  { %420 = vrot.lane.b32.xlu1 %v969_v41, %s1010_s29 }
 0x8f7   :  { %v971_v43 = vpop.eup %970 }
 0x8f8   :  { %v414_v44 = vadd.f32 1.0, %v971_v43 }
 0x8fa   :  { %972 = vrcp.f32 %v414_v44 }
 0x907   :  { %v973_v45 = vpop.eup %972 }
 0x908   :  { %v418_v39 = vmul.f32 %v973_v45, %v356_v27 }
 0x968   :  { %v421_v46 = vpop.permute.xlu1 %420 }
 0x969   :  { %v423_v47 = vmul.f32 %v973_v45, %v421_v46 }
 0x96b   :  { %425 = vrot.lane.b32.xlu0 %v423_v47, %s1011_s30 }
 0x9dd   :  { %v426_v48 = vpop.permute.xlu0 %425 }
 0x9de   :  { %v428_v49 = vadd.f32 %v426_v48, %v418_v39 }
 0x9e0   :  { %974 = vtanh.f32 %v428_v49 }
 0x9ed   :  { %v975_v50 = vpop.eup %974 }
 0x9ee   :  { %431 = vrot.lane.b32.xlu1 %v975_v50, %s1010_s29 }
 0xa60   :  { %v432_v51 = vpop.permute.xlu1 %431 }
 0xa61   :  { %v434_v52 = vmul.f32 %v973_v45, %v432_v51 }
 0xa63   :  { %v1173_v53 = vpack.c.bf16 %v434_v52, %v434_v52 }
 0xa65   :  { %437 = vrot.lane.b32.xlu0 %v1173_v53, %s1011_s30 }
 0xad7   :  { %v438_v54 = vpop.permute.xlu0 %437 }
 0xad8   :  { %909 = vmatmul.mubr.msk.bf16.vlgmr.msra.gmra.mxu0 %vm22_vm3, %v438_v54 }
 0xad9   :  { %921 = vmatpush3.bf16.msra.mxu0 %v1047_v3  ;;  %924 = vmatprep.mubr.msk.bf16.mxu0 %vm1009_vm1, %v1008_v1 }
 0xada   :  { %922 = vmatprep.subr.bf16.mxu0 %v1008_v1 }
 0xadd   :  { %923 = vmatpush3.bf16.msra.mxu0 %v1069_v10 }
 0xb98   :  { %v476_v56 = vpop.f32.mrf.mxu0 }
 0xb99   :  { %v482_v57 = vadd.f32 %v476_v56, %v113_v55 }
 0xb9a   :  { %v910_v58 = vpop.f32.mrf.mxu0 }
 0xb9b   :  { %976 = vtanh.f32 %v482_v57  ;;  %v810_v62 = vmul.f32 -1.442695, %v482_v57 }
 0xb9c   :  { %v479_v59 = vpop.f32.mrf.mxu0 }
 0xb9d   :  { %978 = vpow2.f32 %v810_v62 }
 0xb9e   :  { %v911_v60 = vpop.f32.mrf.mxu0 }
 0xb9f   :  { %v124_v60 = vadd.f32 %v1148_v8, %v1093_v14 }
 0xba8   :  { %v977_v61 = vpop.eup %976 }
 0xba9   :  { %492 = vrot.lane.b32.xlu1 %v977_v61, %s1010_s29 }
 0xbaa   :  { %v979_v63 = vpop.eup %978 }
 0xbab   :  { %v486_v0 = vadd.f32 1.0, %v979_v63 }
 0xbad   :  { %980 = vrcp.f32 %v486_v0 }
 0xbba   :  { %v981_v2 = vpop.eup %980 }
 0xbbb   :  { %v490_v7 = vmul.f32 %v981_v2, %v428_v49 }
 0xc1b   :  { %v493_v5 = vpop.permute.xlu1 %492 }
 0xc1c   :  { %v495_v11 = vmul.f32 %v981_v2, %v493_v5 }
 0xc1e   :  { %497 = vrot.lane.b32.xlu0 %v495_v11, %s1011_s30 }
 0xc90   :  { %v498_v12 = vpop.permute.xlu0 %497 }
 0xc91   :  { %v500_v15 = vadd.f32 %v498_v12, %v490_v7 }
 0xc93   :  { %982 = vtanh.f32 %v500_v15 }
 0xca0   :  { %v983_v16 = vpop.eup %982 }
 0xca1   :  { %503 = vrot.lane.b32.xlu1 %v983_v16, %s1010_s29 }
 0xd13   :  { %v504_v17 = vpop.permute.xlu1 %503 }
 0xd14   :  { %v506_v18 = vmul.f32 %v981_v2, %v504_v17 }
 0xd16   :  { %v1188_v19 = vpack.c.bf16 %v506_v18, %v506_v18 }
 0xd18   :  { %509 = vrot.lane.b32.xlu0 %v1188_v19, %s1011_s30 }
 0xd8a   :  { %v510_v20 = vpop.permute.xlu0 %509 }
 0xd8b   :  { %917 = vmatmul.mubr.msk.bf16.vlgmr.msra.gmra.mxu1 %vm22_vm3, %v510_v20 }
 0xd8c   :  { %929 = vmatpush3.bf16.msra.mxu1 %v1047_v3  ;;  %932 = vmatprep.mubr.msk.bf16.mxu1 %vm1009_vm1, %v1008_v1 }
 0xd8d   :  { %930 = vmatprep.subr.bf16.mxu1 %v1008_v1 }
 0xd90   :  { %931 = vmatpush3.bf16.msra.mxu1 %v1069_v10 }
 0xe4b   :  { %v548_v22 = vpop.f32.mrf.mxu1 }
 0xe4c   :  { %v554_v23 = vadd.f32 %v548_v22, %v116_v21 }
 0xe4d   :  { %v918_v24 = vpop.f32.mrf.mxu1 }
 0xe4e   :  { %984 = vtanh.f32 %v554_v23  ;;  %v812_v3 = vmul.f32 -1.442695, %v554_v23 }
 0xe4f   :  { %v551_v25 = vpop.f32.mrf.mxu1 }
 0xe50   :  { %986 = vpow2.f32 %v812_v3 }
 0xe51   :  { %v919_v13 = vpop.f32.mrf.mxu1 }
 0xe5b   :  { %v985_v26 = vpop.eup %984 }
 0xe5c   :  { %564 = vrot.lane.b32.xlu1 %v985_v26, %s1010_s29 }
 0xe5d   :  { %v987_v27 = vpop.eup %986 }
 0xe5e   :  { %v558_v28 = vadd.f32 1.0, %v987_v27 }
 0xe60   :  { %988 = vrcp.f32 %v558_v28 }
 0xe6d   :  { %v989_v1 = vpop.eup %988 }
 0xe6e   :  { %v562_v9 = vmul.f32 %v989_v1, %v500_v15 }
 0xece   :  { %v565_v29 = vpop.permute.xlu1 %564 }
 0xecf   :  { %v567_v10 = vmul.f32 %v989_v1, %v565_v29 }
 0xed1   :  { %569 = vrot.lane.b32.xlu0 %v567_v10, %s1011_s30 }
 0xf43   :  { %v570_v30 = vpop.permute.xlu0 %569 }
 0xf44   :  { %v572_v32 = vadd.f32 %v570_v30, %v562_v9 }
 0xf46   :  { %990 = vtanh.f32 %v572_v32 }
 0xf53   :  { %v991_v33 = vpop.eup %990 }
 0xf54   :  { %575 = vrot.lane.b32.xlu1 %v991_v33, %s1010_s29 }
 0xfc6   :  { %v576_v34 = vpop.permute.xlu1 %575 }
 0xfc7   :  { %v578_v35 = vmul.f32 %v989_v1, %v576_v34 }
 0xfc9   :  { %v1203_v36 = vpack.c.bf16 %v578_v35, %v578_v35 }
 0xfcb   :  { %581 = vrot.lane.b32.xlu0 %v1203_v36, %s1011_s30 }
0x103d   :  { %v582_v38 = vpop.permute.xlu0 %581 }
0x103e   :  { %925 = vmatmul.mubr.msk.bf16.vlgmr.msra.gmra.mxu0 %vm22_vm3, %v582_v38 }
0x10fe   :  { %v620_v41 = vpop.f32.mrf.mxu0 }
0x10ff   :  { %v626_v42 = vadd.f32 %v620_v41, %v121_v40 }
0x1100   :  { %v926_v43 = vpop.f32.mrf.mxu0 }
0x1101   :  { %992 = vtanh.f32 %v626_v42  ;;  %v814_v47 = vmul.f32 -1.442695, %v626_v42 }
0x1102   :  { %v623_v44 = vpop.f32.mrf.mxu0 }
0x1103   :  { %994 = vpow2.f32 %v814_v47 }
0x1104   :  { %v927_v45 = vpop.f32.mrf.mxu0 }
0x110e   :  { %v993_v46 = vpop.eup %992 }
0x110f   :  { %636 = vrot.lane.b32.xlu1 %v993_v46, %s1010_s29 }
0x1110   :  { %v995_v39 = vpop.eup %994 }
0x1111   :  { %v630_v48 = vadd.f32 1.0, %v995_v39 }
0x1113   :  { %996 = vrcp.f32 %v630_v48 }
0x1120   :  { %v997_v49 = vpop.eup %996 }
0x1121   :  { %v634_v6 = vmul.f32 %v997_v49, %v572_v32 }
0x1181   :  { %v637_v50 = vpop.permute.xlu1 %636 }
0x1182   :  { %v639_v51 = vmul.f32 %v997_v49, %v637_v50 }
0x1184   :  { %641 = vrot.lane.b32.xlu0 %v639_v51, %s1011_s30 }
0x11f6   :  { %v642_v52 = vpop.permute.xlu0 %641 }
0x11f7   :  { %v644_v54 = vadd.f32 %v642_v52, %v634_v6 }
0x11f9   :  { %998 = vtanh.f32 %v644_v54 }
0x1206   :  { %v999_v55 = vpop.eup %998 }
0x1207   :  { %647 = vrot.lane.b32.xlu1 %v999_v55, %s1010_s29 }
0x1279   :  { %v648_v56 = vpop.permute.xlu1 %647 }
0x127a   :  { %v650_v57 = vmul.f32 %v997_v49, %v648_v56 }
0x127c   :  { %v651_v58 = vpack.c.bf16 %v650_v57, %v650_v57 }
0x127e   :  { %653 = vrot.lane.b32.xlu0 %v651_v58, %s1011_s30 }
0x12f0   :  { %v654_v59 = vpop.permute.xlu0 %653 }
0x12f1   :  { %933 = vmatmul.mubr.msk.bf16.vlgmr.msra.gmra.mxu1 %vm22_vm3, %v654_v59 }
0x13b1   :  { %v692_v61 = vpop.f32.mrf.mxu1 }
0x13b2   :  { %v698_v62 = vadd.f32 %v692_v61, %v124_v60 }
0x13b3   :  { %v934_v63 = vpop.f32.mrf.mxu1 }
0x13b4   :  { %1000 = vtanh.f32 %v698_v62  ;;  %v816_v11 = vmul.f32 -1.442695, %v698_v62 }
0x13b5   :  { %v695_v0 = vpop.f32.mrf.mxu1 }
0x13b6   :  { %1002 = vpow2.f32 %v816_v11 }
0x13b7   :  { %v935_v2 = vpop.f32.mrf.mxu1 }
0x13c1   :  { %v1001_v5 = vpop.eup %1000 }
0x13c2   :  { %708 = vrot.lane.b32.xlu1 %v1001_v5, %s1010_s29 }
0x13c3   :  { %v1003_v7 = vpop.eup %1002 }
0x13c4   :  { %v702_v12 = vadd.f32 1.0, %v1003_v7 }
0x13c6   :  { %1004 = vrcp.f32 %v702_v12 }
0x13d3   :  { %v1005_v15 = vpop.eup %1004 }
0x13d4   :  { %v706_v14 = vmul.f32 %v1005_v15, %v644_v54 }
0x1434   :  { %v709_v16 = vpop.permute.xlu1 %708 }
0x1435   :  { %v711_v17 = vmul.f32 %v1005_v15, %v709_v16 }
0x1437   :  { %713 = vrot.lane.b32.xlu0 %v711_v17, %s1011_s30 }
0x143b   :  { %757 = vrot.lane.b32.xlu0 %v1100_v37, %s1011_s30 }
0x143f   :  { %761 = vrot.lane.b32.xlu0 %v1157_v31, %s1011_s30 }
0x1443   :  { %765 = vrot.lane.b32.xlu0 %v1188_v19, %s1011_s30 }
0x14a9   :  { %v714_v8 = vpop.permute.xlu0 %713 }
0x14aa   :  { %v716_v18 = vadd.f32 %v714_v8, %v706_v14 }
0x14ac   :  { %1006 = vtanh.f32 %v716_v18 }
0x14ad   :  { %v758_v20 = vpop.permute.xlu0 %757 }
0x14ae   :  { %782 = vst.msk [vmem:[%s1273_s4] sm:$0xf] %vm781_vm4, %v758_v20 }
0x14b1   :  { %v762_v21 = vpop.permute.xlu0 %761 }
0x14b2   :  { %784 = vst.msk [vmem:[%s1273_s4 + $0x8] sm:$0xf] %vm781_vm4, %v762_v21 }
0x14b5   :  { %v766_v37 = vpop.permute.xlu0 %765 }
0x14b6   :  { %786 = vst.msk [vmem:[%s1273_s4 + $0x10] sm:$0xf] %vm781_vm4, %v766_v37 }
0x14b9   :  { %v1007_v31 = vpop.eup %1006 }
0x14ba   :  { %719 = vrot.lane.b32.xlu1 %v1007_v31, %s1010_s29 }
0x14be   :  { %729 = vrot.lane.b32.xlu1 %v716_v18, %s1012_s17 }
0x14c2   :  { %759 = vrot.lane.b32.xlu1 %v1133_v4, %s1011_s30 }
0x14c6   :  { %763 = vrot.lane.b32.xlu1 %v1173_v53, %s1011_s30 }
0x14ca   :  { %767 = vrot.lane.b32.xlu1 %v1203_v36, %s1011_s30 }
0x152c   :  { %v720_v19 = vpop.permute.xlu1 %719 }
0x152d   :  { %v722_v22 = vmul.f32 %v1005_v15, %v720_v19 }
0x152f   :  { %v832_v23 = vpack.c.bf16 %v722_v22, %v722_v22  ;;  %724 = vrot.lane.b32.xlu0 %v722_v22, %s1011_s30 }
0x1530   :  { %v730_v24 = vpop.permute.xlu1 %729 }
0x1531   :  { %732 = vst.msk [vmem:[#allocation3] sm:$0xff] %vm22_vm3, %v730_v24  ;;  %771 = vrot.lane.b32.xlu1 %v832_v23, %s1011_s30 }
0x1533   :  { %769 = vrot.lane.b32.xlu0 %v651_v58, %s1011_s30 }
0x1534   :  { %v760_v25 = vpop.permute.xlu1 %759 }
0x1535   :  { %783 = vst.msk [vmem:[%s1273_s4 + $0x4] sm:$0xf] %vm781_vm4, %v760_v25 }
0x1538   :  { %v764_v4 = vpop.permute.xlu1 %763 }
0x1539   :  { %785 = vst.msk [vmem:[%s1273_s4 + $0xc] sm:$0xf] %vm781_vm4, %v764_v4 }
0x153c   :  { %v768_v53 = vpop.permute.xlu1 %767 }
0x153d   :  { %787 = vst.msk [vmem:[%s1273_s4 + $0x14] sm:$0xf] %vm781_vm4, %v768_v53 }
0x15a1   :  { %v725_v13 = vpop.permute.xlu0 %724 }
0x15a2   :  { %727 = vst.msk [vmem:[#allocation2] sm:$0xff] %vm22_vm3, %v725_v13 }
0x15a3   :  { %v772_v26 = vpop.permute.xlu1 %771 }
0x15a4   :  { %789 = vst.msk [vmem:[%s1273_s4 + $0x1c] sm:$0xf] %vm781_vm4, %v772_v26 }
0x15a5   :  { %v770_v3 = vpop.permute.xlu0 %769 }
0x15a6   :  { %788 = vst.msk [vmem:[%s1273_s4 + $0x18] sm:$0xf] %vm781_vm4, %v770_v3 }

// kernel: rnn_forward.3
= control target key start
LH: loop header
LB: loop body
LE: loop exit
PB: predicated region body
PF: predicated region fallthrough
CT: control target
= control target key end

     0   :  { %vm22_vm0 = vcmask 261120   ;;  %v979_v0 = vmov 0.0   ;;  %vm980_vm1 = vmmov 0   ;;  %s981_s27 = smov 64   ;;  %s982_s28 = smov 32   ;;  %s1171_s1 = inlined_call_operand.vmem [shape: bf16[32,128], index: 1, kind: input, shape index: {}]   ;;  %s1172_s2 = inlined_call_operand.vmem [shape: bf16[32,128], index: 2, kind: input, shape index: {}]   ;;  %s1173_s0 = inlined_call_operand.vmem [shape: bf16[64,32], index: 0, kind: input, shape index: {}]   ;;  %s1174_s3 = inlined_call_operand.vmem [shape: f32[1,128], index: 3, kind: input, shape index: {}]   ;;  %s1175_s4 = inlined_call_operand.vmem [shape: f32[8,32], index: 4, kind: output, shape index: {}]  }
   0x1   :  { %838 = vmatprep.subr.bf16.mxu1 %v979_v0  ;;  %v907_v1 = vld [vmem:[%s1171_s1 + $0x8] sm:$0xff]   ;;  %842 = vmatprep.mubr.msk.bf16.mxu1 %vm980_vm1, %v979_v0  ;;  %23 = vst.msk [vmem:[#allocation2] sm:$0xff] %vm22_vm0, %v979_v0  ;;  %24 = vst.msk [vmem:[#allocation3] sm:$0xff] %vm22_vm0, %v979_v0  ;;  %v909_v3 = vld [vmem:[%s1171_s1] sm:$0xff]  }
   0x2   :  { %v1022_v2 = vld [vmem:[%s1172_s2 + $0x8] sm:$0xff]   ;;  %826 = vmatprep.subr.bf16.mxu0 %v907_v1  ;;  %v1031_v4 = vld [vmem:[%s1172_s2] sm:$0xff]   ;;  %v913_v53 = vld [vmem:[%s1173_s0 + $0x10] sm:$0xff]  }
   0x3   :  { %839 = vmatpush3.bf16.msra.mxu1 %v1022_v2  ;;  %827 = vmatpush3.bf16.msra.mxu0 %v907_v1  ;;  %v911_v5 = vld [vmem:[%s1173_s0] sm:$0xff]   ;;  %v912_v6 = vld [vmem:[%s1173_s0 + $0x8] sm:$0xff]   ;;  %v914_v54 = vld [vmem:[%s1173_s0 + $0x18] sm:$0xff]   ;;  %s983_s0 = smov 96  }
   0x4   :  { %840 = vmatprep.subr.bf16.mxu1 %v979_v0  ;;  %828 = vmatprep.subr.bf16.mxu0 %v909_v3  ;;  %v1061_v11 = vld [vmem:[%s1174_s3] ss:$0 sm:$0xff] }
   0x5   :  { %830 = vmatprep.mubr.msk.bf16.mxu0 %vm22_vm0, %v911_v5 }
   0x7   :  { %841 = vmatpush3.bf16.msra.mxu1 %v1031_v4  ;;  %829 = vmatpush3.bf16.msra.mxu0 %v909_v3 }
   0x8   :  { %v158_v7 = vld [vmem:[#allocation2] sm:$0xff]  ;;  %846 = vmatprep.subr.bf16.mxu1 %v979_v0  ;;  %854 = vmatprep.subr.bf16.mxu0 %v979_v0  ;;  %v159_v19 = vld [vmem:[#allocation3] sm:$0xff] }
   0x9   :  { %v160_v8 = vpack.c.bf16 %v158_v7, %v158_v7 }
   0xa   :  { %831 = vmatmul.mubr.msk.bf16.vlgmr.msra.gmra.mxu0 %vm22_vm0, %v912_v6 }
   0xb   :  { %843 = vmatmul.mubr.msk.bf16.vlgmr.msra.gmra.mxu1 %vm22_vm0, %v160_v8  ;;  %855 = vmatpush3.bf16.msra.mxu0 %v1022_v2 }
   0xc   :  { %847 = vmatpush3.bf16.msra.mxu1 %v1022_v2  ;;  %850 = vmatprep.mubr.msk.bf16.mxu1 %vm980_vm1, %v979_v0 }
   0xd   :  { %848 = vmatprep.subr.bf16.mxu1 %v979_v0  ;;  %856 = vmatprep.subr.bf16.mxu0 %v979_v0 }
   0xe   :  { %834 = vmatprep.mubr.msk.bf16.mxu0 %vm22_vm0, %v913_v53 }
   0xf   :  { %857 = vmatpush3.bf16.msra.mxu0 %v1031_v4 }
  0x10   :  { %849 = vmatpush3.bf16.msra.mxu1 %v1031_v4  ;;  %870 = vmatprep.subr.bf16.mxu0 %v979_v0 }
  0x11   :  { %862 = vmatprep.subr.bf16.mxu1 %v979_v0 }
  0x12   :  { %835 = vmatmul.mubr.msk.bf16.gmra.mxu0 %vm22_vm0, %v914_v54 }
  0x13   :  { %858 = vmatprep.mubr.msk.bf16.mxu0 %vm980_vm1, %v979_v0 }
  0xca   :  { %v1056_v10 = vpop.f32.mrf.mxu0 }
  0xcb   :  { %v210_v9 = vpop.f32.mrf.mxu1  ;;  %v132_v1 = vadd.f32 %v1056_v10, %v1061_v11 }
  0xcc   :  { %v123_v13 = vpop.f32.mrf.mxu0 }
  0xcd   :  { %v844_v12 = vpop.f32.mrf.mxu1  ;;  %v124_v14 = vadd.f32 %v1061_v11, %v123_v13 }
  0xce   :  { %v1076_v35 = vpop.f32.mrf.mxu0 }
  0xcf   :  { %v213_v15 = vpop.f32.mrf.mxu1  ;;  %v216_v16 = vadd.f32 %v210_v9, %v124_v14 }
  0xd0   :  { %v126_v36 = vpop.f32.mrf.mxu0 }
  0xd1   :  { %v845_v17 = vpop.f32.mrf.mxu1  ;;  %915 = vtanh.f32 %v216_v16  ;;  %v781_v20 = vmul.f32 -1.442695, %v216_v16  ;;  %v127_v37 = vadd.f32 %v1061_v11, %v126_v36 }
  0xd2   :  { %v1100_v60 = vpop.f32.mrf.mxu0 }
  0xd3   :  { %917 = vpow2.f32 %v781_v20 }
  0xd4   :  { %v1102_v61 = vpop.f32.mrf.mxu0 }
  0xd6   :  { %v1104_v62 = vpop.f32.mrf.mxu0 }
  0xd8   :  { %v1106_v63 = vpop.f32.mrf.mxu0 }
  0xde   :  { %v916_v18 = vpop.eup %915 }
  0xdf   :  { %230 = vrot.lane.b32.xlu0 %v916_v18, %s981_s27 }
  0xe0   :  { %v918_v21 = vpop.eup %917 }
  0xe1   :  { %v220_v22 = vadd.f32 1.0, %v918_v21 }
  0xe3   :  { %225 = vrot.lane.b32.xlu0 %v159_v19, %s982_s28  ;;  %919 = vrcp.f32 %v220_v22 }
  0xf0   :  { %v920_v23 = vpop.eup %919 }
 0x151   :  { %v231_v24 = vpop.permute.xlu0 %230 }
 0x152   :  { %v233_v25 = vmul.f32 %v920_v23, %v231_v24 }
 0x154   :  { %235 = vrot.lane.b32.xlu1 %v233_v25, %s982_s28  ;;  %v135_v25 = vadd.f32 %v1076_v35, %v1061_v11 }
 0x155   :  { %v226_v26 = vpop.permute.xlu0 %225 }
 0x156   :  { %v228_v27 = vmul.f32 %v920_v23, %v226_v26 }
 0x1c6   :  { %v236_v28 = vpop.permute.xlu1 %235 }
 0x1c7   :  { %v238_v29 = vadd.f32 %v236_v28, %v228_v27 }
 0x1c9   :  { %921 = vtanh.f32 %v238_v29 }
 0x1d6   :  { %v922_v30 = vpop.eup %921 }
 0x1d7   :  { %241 = vrot.lane.b32.xlu1 %v922_v30, %s981_s27 }
 0x249   :  { %v242_v31 = vpop.permute.xlu1 %241 }
 0x24a   :  { %v244_v32 = vmul.f32 %v920_v23, %v242_v31 }
 0x24c   :  { %v245_v33 = vpack.c.bf16 %v244_v32, %v244_v32 }
 0x24e   :  { %247 = vrot.lane.b32.xlu0 %v245_v33, %s982_s28 }
 0x2c0   :  { %v248_v34 = vpop.permute.xlu0 %247 }
 0x2c1   :  { %851 = vmatmul.mubr.msk.bf16.vlgmr.msra.gmra.mxu1 %vm22_vm0, %v248_v34 }
 0x2c2   :  { %863 = vmatpush3.bf16.msra.mxu1 %v1022_v2  ;;  %866 = vmatprep.mubr.msk.bf16.mxu1 %vm980_vm1, %v979_v0 }
 0x2c3   :  { %864 = vmatprep.subr.bf16.mxu1 %v979_v0 }
 0x2c6   :  { %865 = vmatpush3.bf16.msra.mxu1 %v1031_v4 }
 0x2c7   :  { %878 = vmatprep.subr.bf16.mxu1 %v979_v0 }
 0x381   :  { %v286_v38 = vpop.f32.mrf.mxu1 }
 0x382   :  { %v292_v39 = vadd.f32 %v286_v38, %v127_v37 }
 0x383   :  { %v852_v40 = vpop.f32.mrf.mxu1 }
 0x384   :  { %923 = vtanh.f32 %v292_v39  ;;  %v783_v44 = vmul.f32 -1.442695, %v292_v39 }
 0x385   :  { %v289_v41 = vpop.f32.mrf.mxu1 }
 0x386   :  { %925 = vpow2.f32 %v783_v44 }
 0x387   :  { %v853_v42 = vpop.f32.mrf.mxu1 }
 0x391   :  { %v924_v43 = vpop.eup %923 }
 0x392   :  { %302 = vrot.lane.b32.xlu1 %v924_v43, %s981_s27 }
 0x393   :  { %v926_v45 = vpop.eup %925 }
 0x394   :  { %v296_v46 = vadd.f32 1.0, %v926_v45 }
 0x396   :  { %927 = vrcp.f32 %v296_v46  ;;  %v140_v46 = vadd.f32 %v1061_v11, %v1102_v61 }
 0x3a3   :  { %v928_v47 = vpop.eup %927 }
 0x3a4   :  { %v300_v50 = vmul.f32 %v928_v47, %v238_v29 }
 0x404   :  { %v303_v48 = vpop.permute.xlu1 %302 }
 0x405   :  { %v305_v49 = vmul.f32 %v928_v47, %v303_v48 }
 0x407   :  { %307 = vrot.lane.b32.xlu0 %v305_v49, %s982_s28 }
 0x479   :  { %v308_v51 = vpop.permute.xlu0 %307 }
 0x47a   :  { %v310_v52 = vadd.f32 %v308_v51, %v300_v50 }
 0x47c   :  { %929 = vtanh.f32 %v310_v52 }
 0x489   :  { %v930_v55 = vpop.eup %929 }
 0x48a   :  { %313 = vrot.lane.b32.xlu1 %v930_v55, %s981_s27 }
 0x4fc   :  { %v314_v56 = vpop.permute.xlu1 %313 }
 0x4fd   :  { %v316_v57 = vmul.f32 %v928_v47, %v314_v56 }
 0x4ff   :  { %v317_v58 = vpack.c.bf16 %v316_v57, %v316_v57 }
 0x501   :  { %319 = vrot.lane.b32.xlu0 %v317_v58, %s982_s28 }
 0x573   :  { %v320_v59 = vpop.permute.xlu0 %319 }
 0x574   :  { %859 = vmatmul.mubr.msk.bf16.vlgmr.msra.gmra.mxu0 %vm22_vm0, %v320_v59 }
 0x575   :  { %871 = vmatpush3.bf16.msra.mxu0 %v1022_v2  ;;  %874 = vmatprep.mubr.msk.bf16.mxu0 %vm980_vm1, %v979_v0 }
 0x576   :  { %872 = vmatprep.subr.bf16.mxu0 %v979_v0 }
 0x579   :  { %873 = vmatpush3.bf16.msra.mxu0 %v1031_v4 }
 0x57a   :  { %886 = vmatprep.subr.bf16.mxu0 %v979_v0 }
 0x634   :  { %v358_v3 = vpop.f32.mrf.mxu0 }
 0x635   :  { %v364_v5 = vadd.f32 %v358_v3, %v132_v1 }
 0x636   :  { %v860_v6 = vpop.f32.mrf.mxu0 }
 0x637   :  { %931 = vtanh.f32 %v364_v5  ;;  %v785_v12 = vmul.f32 -1.442695, %v364_v5 }
 0x638   :  { %v361_v7 = vpop.f32.mrf.mxu0 }
 0x639   :  { %933 = vpow2.f32 %v785_v12 }
 0x63a   :  { %v861_v8 = vpop.f32.mrf.mxu0 }
 0x644   :  { %v932_v9 = vpop.eup %931 }
 0x645   :  { %374 = vrot.lane.b32.xlu1 %v932_v9, %s981_s27  ;;  %v143_v9 = vadd.f32 %v1061_v11, %v1106_v63 }
 0x646   :  { %v934_v13 = vpop.eup %933 }
 0x647   :  { %v368_v14 = vadd.f32 1.0, %v934_v13 }
 0x649   :  { %935 = vrcp.f32 %v368_v14 }
 0x656   :  { %v936_v15 = vpop.eup %935 }
 0x657   :  { %v372_v10 = vmul.f32 %v936_v15, %v310_v52 }
 0x6b7   :  { %v375_v16 = vpop.permute.xlu1 %374 }
 0x6b8   :  { %v377_v17 = vmul.f32 %v936_v15, %v375_v16 }
 0x6ba   :  { %379 = vrot.lane.b32.xlu0 %v377_v17, %s982_s28 }
 0x72c   :  { %v380_v18 = vpop.permute.xlu0 %379 }
 0x72d   :  { %v382_v19 = vadd.f32 %v380_v18, %v372_v10 }
 0x72f   :  { %937 = vtanh.f32 %v382_v19 }
 0x73c   :  { %v938_v20 = vpop.eup %937 }
 0x73d   :  { %385 = vrot.lane.b32.xlu1 %v938_v20, %s981_s27 }
 0x7af   :  { %v386_v21 = vpop.permute.xlu1 %385 }
 0x7b0   :  { %v388_v22 = vmul.f32 %v936_v15, %v386_v21 }
 0x7b2   :  { %v389_v23 = vpack.c.bf16 %v388_v22, %v388_v22 }
 0x7b4   :  { %391 = vrot.lane.b32.xlu0 %v389_v23, %s982_s28 }
 0x826   :  { %v392_v24 = vpop.permute.xlu0 %391 }
 0x827   :  { %867 = vmatmul.mubr.msk.bf16.vlgmr.msra.gmra.mxu1 %vm22_vm0, %v392_v24 }
 0x828   :  { %879 = vmatpush3.bf16.msra.mxu1 %v1022_v2  ;;  %882 = vmatprep.mubr.msk.bf16.mxu1 %vm980_vm1, %v979_v0 }
 0x829   :  { %880 = vmatprep.subr.bf16.mxu1 %v979_v0 }
 0x82c   :  { %881 = vmatpush3.bf16.msra.mxu1 %v1031_v4 }
 0x82d   :  { %894 = vmatprep.subr.bf16.mxu1 %v979_v0 }
 0x8e7   :  { %v430_v26 = vpop.f32.mrf.mxu1 }
 0x8e8   :  { %v436_v27 = vadd.f32 %v430_v26, %v135_v25 }
 0x8e9   :  { %v868_v28 = vpop.f32.mrf.mxu1 }
 0x8ea   :  { %939 = vtanh.f32 %v436_v27  ;;  %v787_v32 = vmul.f32 -1.442695, %v436_v27  ;;  %v148_v27 = vadd.f32 %v1100_v60, %v1061_v11 }
 0x8eb   :  { %v433_v29 = vpop.f32.mrf.mxu1 }
 0x8ec   :  { %941 = vpow2.f32 %v787_v32 }
 0x8ed   :  { %v869_v30 = vpop.f32.mrf.mxu1 }
 0x8f7   :  { %v940_v31 = vpop.eup %939 }
 0x8f8   :  { %446 = vrot.lane.b32.xlu1 %v940_v31, %s981_s27 }
 0x8f9   :  { %v942_v33 = vpop.eup %941 }
 0x8fa   :  { %v440_v34 = vadd.f32 1.0, %v942_v33 }
 0x8fc   :  { %943 = vrcp.f32 %v440_v34 }
 0x909   :  { %v944_v36 = vpop.eup %943 }
 0x90a   :  { %v444_v35 = vmul.f32 %v944_v36, %v382_v19 }
 0x96a   :  { %v447_v37 = vpop.permute.xlu1 %446 }
 0x96b   :  { %v449_v38 = vmul.f32 %v944_v36, %v447_v37 }
 0x96d   :  { %451 = vrot.lane.b32.xlu0 %v449_v38, %s982_s28 }
 0x9df   :  { %v452_v39 = vpop.permute.xlu0 %451 }
 0x9e0   :  { %v454_v40 = vadd.f32 %v452_v39, %v444_v35 }
 0x9e2   :  { %945 = vtanh.f32 %v454_v40 }
 0x9ef   :  { %v946_v41 = vpop.eup %945 }
 0x9f0   :  { %457 = vrot.lane.b32.xlu1 %v946_v41, %s981_s27 }
 0xa62   :  { %v458_v42 = vpop.permute.xlu1 %457 }
 0xa63   :  { %v460_v43 = vmul.f32 %v944_v36, %v458_v42 }
 0xa65   :  { %v461_v44 = vpack.c.bf16 %v460_v43, %v460_v43 }
 0xa67   :  { %463 = vrot.lane.b32.xlu0 %v461_v44, %s982_s28 }
 0xad9   :  { %v464_v45 = vpop.permute.xlu0 %463 }
 0xada   :  { %875 = vmatmul.mubr.msk.bf16.vlgmr.msra.gmra.mxu0 %vm22_vm0, %v464_v45 }
 0xadb   :  { %887 = vmatpush3.bf16.msra.mxu0 %v1022_v2  ;;  %890 = vmatprep.mubr.msk.bf16.mxu0 %vm980_vm1, %v979_v0 }
 0xadc   :  { %888 = vmatprep.subr.bf16.mxu0 %v979_v0 }
 0xadf   :  { %889 = vmatpush3.bf16.msra.mxu0 %v1031_v4 }
 0xb9a   :  { %v502_v47 = vpop.f32.mrf.mxu0 }
 0xb9b   :  { %v508_v48 = vadd.f32 %v502_v47, %v140_v46  ;;  %v151_v47 = vadd.f32 %v1104_v62, %v1061_v11 }
 0xb9c   :  { %v876_v49 = vpop.f32.mrf.mxu0 }
 0xb9d   :  { %947 = vtanh.f32 %v508_v48  ;;  %v789_v53 = vmul.f32 -1.442695, %v508_v48 }
 0xb9e   :  { %v505_v50 = vpop.f32.mrf.mxu0 }
 0xb9f   :  { %949 = vpow2.f32 %v789_v53 }
 0xba0   :  { %v877_v51 = vpop.f32.mrf.mxu0 }
 0xbaa   :  { %v948_v52 = vpop.eup %947 }
 0xbab   :  { %518 = vrot.lane.b32.xlu1 %v948_v52, %s981_s27 }
 0xbac   :  { %v950_v54 = vpop.eup %949 }
 0xbad   :  { %v512_v55 = vadd.f32 1.0, %v950_v54 }
 0xbaf   :  { %951 = vrcp.f32 %v512_v55 }
 0xbbc   :  { %v952_v56 = vpop.eup %951 }
 0xbbd   :  { %v516_v59 = vmul.f32 %v952_v56, %v454_v40 }
 0xc1d   :  { %v519_v57 = vpop.permute.xlu1 %518 }
 0xc1e   :  { %v521_v58 = vmul.f32 %v952_v56, %v519_v57 }
 0xc20   :  { %523 = vrot.lane.b32.xlu0 %v521_v58, %s982_s28 }
 0xc92   :  { %v524_v61 = vpop.permute.xlu0 %523 }
 0xc93   :  { %v526_v1 = vadd.f32 %v524_v61, %v516_v59 }
 0xc95   :  { %953 = vtanh.f32 %v526_v1 }
 0xca2   :  { %v954_v3 = vpop.eup %953 }
 0xca3   :  { %529 = vrot.lane.b32.xlu1 %v954_v3, %s981_s27 }
 0xd15   :  { %v530_v5 = vpop.permute.xlu1 %529 }
 0xd16   :  { %v532_v6 = vmul.f32 %v952_v56, %v530_v5 }
 0xd18   :  { %v533_v7 = vpack.c.bf16 %v532_v6, %v532_v6 }
 0xd1a   :  { %535 = vrot.lane.b32.xlu0 %v533_v7, %s982_s28 }
 0xd8c   :  { %v536_v8 = vpop.permute.xlu0 %535 }
 0xd8d   :  { %883 = vmatmul.mubr.msk.bf16.vlgmr.msra.gmra.mxu1 %vm22_vm0, %v536_v8 }
 0xd8e   :  { %895 = vmatpush3.bf16.msra.mxu1 %v1022_v2  ;;  %898 = vmatprep.mubr.msk.bf16.mxu1 %vm980_vm1, %v979_v0 }
 0xd8f   :  { %896 = vmatprep.subr.bf16.mxu1 %v979_v0 }
 0xd92   :  { %897 = vmatpush3.bf16.msra.mxu1 %v1031_v4 }
 0xe4d   :  { %v574_v12 = vpop.f32.mrf.mxu1 }
 0xe4e   :  { %v580_v13 = vadd.f32 %v574_v12, %v143_v9 }
 0xe4f   :  { %v884_v14 = vpop.f32.mrf.mxu1 }
 0xe50   :  { %955 = vtanh.f32 %v580_v13  ;;  %v791_v2 = vmul.f32 -1.442695, %v580_v13 }
 0xe51   :  { %v577_v15 = vpop.f32.mrf.mxu1 }
 0xe52   :  { %957 = vpow2.f32 %v791_v2 }
 0xe53   :  { %v885_v16 = vpop.f32.mrf.mxu1 }
 0xe5d   :  { %v956_v17 = vpop.eup %955 }
 0xe5e   :  { %590 = vrot.lane.b32.xlu1 %v956_v17, %s981_s27 }
 0xe5f   :  { %v958_v10 = vpop.eup %957 }
 0xe60   :  { %v584_v18 = vadd.f32 1.0, %v958_v10 }
 0xe62   :  { %959 = vrcp.f32 %v584_v18 }
 0xe6f   :  { %v960_v0 = vpop.eup %959 }
 0xe70   :  { %v588_v63 = vmul.f32 %v960_v0, %v526_v1 }
 0xed0   :  { %v591_v19 = vpop.permute.xlu1 %590 }
 0xed1   :  { %v593_v4 = vmul.f32 %v960_v0, %v591_v19 }
 0xed3   :  { %595 = vrot.lane.b32.xlu0 %v593_v4, %s982_s28 }
 0xf45   :  { %v596_v20 = vpop.permute.xlu0 %595 }
 0xf46   :  { %v598_v21 = vadd.f32 %v596_v20, %v588_v63 }
 0xf48   :  { %961 = vtanh.f32 %v598_v21 }
 0xf55   :  { %v962_v22 = vpop.eup %961 }
 0xf56   :  { %601 = vrot.lane.b32.xlu1 %v962_v22, %s981_s27 }
 0xfc8   :  { %v602_v23 = vpop.permute.xlu1 %601 }
 0xfc9   :  { %v604_v24 = vmul.f32 %v960_v0, %v602_v23 }
 0xfcb   :  { %v605_v25 = vpack.c.bf16 %v604_v24, %v604_v24 }
 0xfcd   :  { %607 = vrot.lane.b32.xlu0 %v605_v25, %s982_s28 }
0x103f   :  { %v608_v26 = vpop.permute.xlu0 %607 }
0x1040   :  { %891 = vmatmul.mubr.msk.bf16.vlgmr.msra.gmra.mxu0 %vm22_vm0, %v608_v26 }
0x1100   :  { %v646_v28 = vpop.f32.mrf.mxu0 }
0x1101   :  { %v652_v29 = vadd.f32 %v646_v28, %v148_v27 }
0x1102   :  { %v892_v30 = vpop.f32.mrf.mxu0 }
0x1103   :  { %963 = vtanh.f32 %v652_v29  ;;  %v793_v34 = vmul.f32 -1.442695, %v652_v29 }
0x1104   :  { %v649_v31 = vpop.f32.mrf.mxu0 }
0x1105   :  { %965 = vpow2.f32 %v793_v34 }
0x1106   :  { %v893_v32 = vpop.f32.mrf.mxu0 }
0x1110   :  { %v964_v33 = vpop.eup %963 }
0x1111   :  { %662 = vrot.lane.b32.xlu1 %v964_v33, %s981_s27 }
0x1112   :  { %v966_v36 = vpop.eup %965 }
0x1113   :  { %v656_v37 = vadd.f32 1.0, %v966_v36 }
0x1115   :  { %967 = vrcp.f32 %v656_v37 }
0x1122   :  { %v968_v38 = vpop.eup %967 }
0x1123   :  { %v660_v60 = vmul.f32 %v968_v38, %v598_v21 }
0x1183   :  { %v663_v35 = vpop.permute.xlu1 %662 }
0x1184   :  { %v665_v39 = vmul.f32 %v968_v38, %v663_v35 }
0x1186   :  { %667 = vrot.lane.b32.xlu0 %v665_v39, %s982_s28 }
0x11f8   :  { %v668_v40 = vpop.permute.xlu0 %667 }
0x11f9   :  { %v670_v41 = vadd.f32 %v668_v40, %v660_v60 }
0x11fb   :  { %969 = vtanh.f32 %v670_v41 }
0x1208   :  { %v970_v42 = vpop.eup %969 }
0x1209   :  { %673 = vrot.lane.b32.xlu1 %v970_v42, %s981_s27 }
0x127b   :  { %v674_v43 = vpop.permute.xlu1 %673 }
0x127c   :  { %v676_v44 = vmul.f32 %v968_v38, %v674_v43 }
0x127e   :  { %v677_v45 = vpack.c.bf16 %v676_v44, %v676_v44 }
0x1280   :  { %679 = vrot.lane.b32.xlu0 %v677_v45, %s982_s28 }
0x12f2   :  { %v680_v46 = vpop.permute.xlu0 %679 }
0x12f3   :  { %899 = vmatmul.mubr.msk.bf16.vlgmr.msra.gmra.mxu1 %vm22_vm0, %v680_v46 }
0x13b3   :  { %v718_v48 = vpop.f32.mrf.mxu1 }
0x13b4   :  { %v724_v49 = vadd.f32 %v718_v48, %v151_v47 }
0x13b5   :  { %v900_v50 = vpop.f32.mrf.mxu1 }
0x13b6   :  { %971 = vtanh.f32 %v724_v49  ;;  %v795_v54 = vmul.f32 -1.442695, %v724_v49 }
0x13b7   :  { %v721_v51 = vpop.f32.mrf.mxu1 }
0x13b8   :  { %973 = vpow2.f32 %v795_v54 }
0x13b9   :  { %v901_v52 = vpop.f32.mrf.mxu1 }
0x13c3   :  { %v972_v53 = vpop.eup %971 }
0x13c4   :  { %734 = vrot.lane.b32.xlu1 %v972_v53, %s981_s27 }
0x13c5   :  { %v974_v55 = vpop.eup %973 }
0x13c6   :  { %v728_v56 = vadd.f32 1.0, %v974_v55 }
0x13c8   :  { %975 = vrcp.f32 %v728_v56 }
0x13d5   :  { %v976_v57 = vpop.eup %975 }
0x13d6   :  { %v732_v11 = vmul.f32 %v976_v57, %v670_v41 }
0x1436   :  { %v735_v58 = vpop.permute.xlu1 %734 }
0x1437   :  { %v737_v59 = vmul.f32 %v976_v57, %v735_v58 }
0x1439   :  { %739 = vrot.lane.b32.xlu0 %v737_v59, %s982_s28 }
0x14ab   :  { %v740_v62 = vpop.permute.xlu0 %739 }
0x14ac   :  { %v742_v61 = vadd.f32 %v740_v62, %v732_v11 }
0x14ae   :  { %977 = vtanh.f32 %v742_v61 }
0x14bb   :  { %v978_v1 = vpop.eup %977 }
0x14bc   :  { %745 = vrot.lane.b32.xlu1 %v978_v1, %s981_s27 }
0x14c0   :  { %755 = vrot.lane.b32.xlu1 %v742_v61, %s983_s0 }
0x152e   :  { %v746_v3 = vpop.permute.xlu1 %745 }
0x152f   :  { %v748_v5 = vmul.f32 %v976_v57, %v746_v3 }
0x1531   :  { %750 = vrot.lane.b32.xlu0 %v748_v5, %s982_s28 }
0x1532   :  { %v756_v6 = vpop.permute.xlu1 %755 }
0x1533   :  { %758 = vst.msk [vmem:[#allocation3] sm:$0xff] %vm22_vm0, %v756_v6 }
0x15a3   :  { %v751_v7 = vpop.permute.xlu0 %750 }
0x15a4   :  { %753 = vst.msk [vmem:[#allocation2] sm:$0xff] %vm22_vm0, %v751_v7  ;;  %762 = vst.msk [vmem:[%s1175_s4] sm:$0xff] %vm22_vm0, %v751_v7 }

</bundles_post_ra>
